<compile_context>
chip_gen: v7x
topology: tpu7x:2x2x1
jax: 0.10.0
libtpu: 0.0.40
codegen_flags: <defaults>
</compile_context>

<pallas_src>
import jax
import jax.numpy as jnp
from jax.experimental import pallas as pl
from jax.experimental.pallas import tpu as pltpu

LANE = 128          # last-dim (lane) alignment
SUBLANE_BF16 = 16   # bf16 packs 2 rows per sublane -> 16-row tiles = dense vregs


def _round_up(n, m):
    return ((n + m - 1) // m) * m


def _cdiv(a, b):
    return (a + b - 1) // b


def _pad2d(a, rows, cols):
    r, c = a.shape
    if r == rows and c == cols:
        return a
    return jnp.pad(a, ((0, rows - r), (0, cols - c)))


def mlp_kernel(x_ref,
               w1_ref, b1_ref,
               w2_ref, b2_ref,
               w3_ref, b3_ref,
               w4_ref, b4_ref,
               w5_ref, b5_ref,
               o_ref):
    """One batch tile: 5 matmuls (bf16 MXU, f32 acc) + bias + ReLU, fused."""

    def layer(h_bf16, w_ref, b_ref, relu):
        a = jnp.dot(h_bf16, w_ref[...],
                    preferred_element_type=jnp.float32) + b_ref[...]
        if relu:
            a = jnp.maximum(a, 0.0)
        return a

    h = x_ref[...]                                           # bf16 [TB, Din_p]
    h = layer(h, w1_ref, b1_ref, True).astype(jnp.bfloat16)
    h = layer(h, w2_ref, b2_ref, True).astype(jnp.bfloat16)
    # Dropout(p=0.5) -> identity in eval mode.
    # TODO(synk): train-mode dropout (pltpu.prng_* random mask) not emulated.
    h = layer(h, w3_ref, b3_ref, True).astype(jnp.bfloat16)
    h = layer(h, w4_ref, b4_ref, True).astype(jnp.bfloat16)
    out = layer(h, w5_ref, b5_ref, False)                    # f32 [TB, Dout_p]
    o_ref[...] = out.astype(o_ref.dtype)


def prepare_params(params):
    """Pad to lane multiples & cast ONCE (keeps pad/convert off the hot path)."""
    din, h1 = params["w1"].shape
    h2 = params["w3"].shape[1]
    dout = params["w5"].shape[1]
    din_p, h1_p, h2_p, dout_p = (_round_up(d, LANE) for d in (din, h1, h2, dout))
    dims_p = ((din_p, h1_p), (h1_p, h1_p), (h1_p, h2_p),
              (h2_p, h2_p), (h2_p, dout_p))
    ws, bs = [], []
    for i, (di, do) in enumerate(dims_p, start=1):
        ws.append(_pad2d(params[f"w{i}"], di, do).astype(jnp.bfloat16))
        bs.append(_pad2d(params[f"b{i}"], 1, do).astype(jnp.float32))
    return {"ws": tuple(ws), "bs": tuple(bs), "dims_p": dims_p,
            "din": din, "dout": dout, "din_p": din_p, "dout_p": dout_p}


def mlp_forward(x, prepared, *, batch_tile=256):
    """x: [B, C, H, W] or [B, D]; prepared: output of prepare_params()."""
    B = x.shape[0]
    x2d = x.reshape(B, -1).astype(jnp.float32)               # torch.flatten(x, 1)
    din, dout = prepared["din"], prepared["dout"]
    din_p, dout_p = prepared["din_p"], prepared["dout_p"]
    ws, bs, dims_p = prepared["ws"], prepared["bs"], prepared["dims_p"]
    assert x2d.shape[1] == din, "flattened input dim mismatch with params"

    # Batch tiling: 16-row aligned; if the whole aligned batch fits one tile,
    # split it in two so v7x's second TensorCore gets work.
    tb_cap = _round_up(batch_tile, SUBLANE_BF16)
    b_aligned = _round_up(B, SUBLANE_BF16)
    if b_aligned <= tb_cap:
        if b_aligned > SUBLANE_BF16:
            tb = _round_up(_cdiv(b_aligned, 2), SUBLANE_BF16)
        else:
            tb = SUBLANE_BF16
    else:
        tb = tb_cap
    b_p = _round_up(b_aligned, tb)
    grid = (b_p // tb,)

    xp = _pad2d(x2d, b_p, din_p).astype(jnp.bfloat16)

    # Generation-aware VMEM budget: v7x has 64 MiB per TC (budget ~40 MiB per
    # core, each core holds its own resident weight copy); v5e/v6e have 128 MiB.
    kind = jax.devices()[0].device_kind.lower()
    vmem_cap = (40 if "v7" in kind else 100) * 1024 * 1024

    wbytes = sum(w.size * 2 for w in ws) + sum(b.size * 4 for b in bs)
    flops = 2 * b_p * sum(di * do for di, do in dims_p)
    bytes_accessed = (xp.size * 2 + wbytes + b_p * dout_p * 4)

    x_spec = pl.BlockSpec((tb, din_p), lambda i: (i, 0))
    out_spec = pl.BlockSpec((tb, dout_p), lambda i: (i, 0))

    def call(single_buffer_weights):
        if single_buffer_weights:
            def const_spec(shape):
                # Constant block index -> never re-fetched; single-buffer it so
                # resident weight footprint is 1x (not 2x).
                return pl.BlockSpec(shape, lambda i: (0, 0),
                                    pipeline_mode=pl.Buffered(1))
            wt_bufs = 1
        else:
            def const_spec(shape):
                return pl.BlockSpec(shape, lambda i: (0, 0))
            wt_bufs = 2

        in_specs = [x_spec]
        args = [xp]
        for w, b in zip(ws, bs):
            in_specs += [const_spec(w.shape), const_spec(b.shape)]
            args += [w, b]

        stream_bytes = 2 * tb * din_p * 2 + 2 * tb * dout_p * 4  # x/out dbl-buf
        est = wt_bufs * wbytes + stream_bytes
        vmem_limit = int(min(vmem_cap, max(32 * 1024 * 1024, int(1.5 * est))))

        return pl.pallas_call(
            mlp_kernel,
            out_shape=jax.ShapeDtypeStruct((b_p, dout_p), jnp.float32),
            grid=grid,
            in_specs=in_specs,
            out_specs=out_spec,
            compiler_params=pltpu.CompilerParams(
                dimension_semantics=("parallel",),   # shard tiles across TCs
                vmem_limit_bytes=vmem_limit),
            cost_estimate=pl.CostEstimate(
                flops=flops, transcendentals=0, bytes_accessed=bytes_accessed),
        )(*args)

    try:
        out = call(True)
        jax.block_until_ready(out)
    except Exception:
        # pl.Buffered(1) unsupported on this jax build -> default buffering.
        out = call(False)

    return out[:B, :dout]


def init_params(key, input_dim, hidden_dim1, hidden_dim2, output_dim):
    """Deterministic init. Weights stored as [in, out] (torch Linear weight.T)."""
    dims = [(input_dim, hidden_dim1),
            (hidden_dim1, hidden_dim1),
            (hidden_dim1, hidden_dim2),
            (hidden_dim2, hidden_dim2),
            (hidden_dim2, output_dim)]
    params = {}
    for i, (din, dout) in enumerate(dims, start=1):
        key, kw, kb = jax.random.split(key, 3)
        bound = 1.0 / (din ** 0.5)   # matches nn.Linear default uniform bound
        params[f"w{i}"] = jax.random.uniform(
            kw, (din, dout), jnp.float32, -bound, bound)
        params[f"b{i}"] = jax.random.uniform(
            kb, (1, dout), jnp.float32, -bound, bound)
    return params


def mlp_reference(x, params):
    """Pure-JAX f32 reference (eval-mode dropout = identity)."""
    B = x.shape[0]
    h = x.reshape(B, -1).astype(jnp.float32)
    for i in range(1, 5):
        h = jnp.maximum(h @ params[f"w{i}"] + params[f"b{i}"], 0.0)
    return h @ params["w5"] + params["b5"]


if __name__ == "__main__":
    key = jax.random.PRNGKey(0)
    k_x, k_p = jax.random.split(key)

    # Small shapes: batch=2, channels=4, spatial=16x16 -> input_dim = 1024.
    B, C, H, W = 2, 4, 16, 16
    input_dim = C * H * W
    hidden_dim1, hidden_dim2, output_dim = 32, 32, 8

    x = jax.random.normal(k_x, (B, C, H, W), dtype=jnp.float32)
    params = init_params(k_p, input_dim, hidden_dim1, hidden_dim2, output_dim)
    prepared = prepare_params(params)   # pad + cast once, outside the hot path

    out = mlp_forward(x, prepared)
    jax.block_until_ready(out)

    assert out.shape == (B, output_dim)
    ref = mlp_reference(x, params)
    max_err = float(jnp.max(jnp.abs(out - ref)))
    assert jnp.allclose(out, ref, rtol=5e-2, atol=5e-2), f"max abs err {max_err}"
    print("KERNEL_OK")
</pallas_src>

<mosaic_0001>
module attributes {stable_mosaic.version = 11 : i64} {
  func.func @mlp_kernel(%arg0: i32, %arg1: memref<16x1024xbf16, #tpu.memory_space<vmem>>, %arg2: memref<1024x128xbf16, #tpu.memory_space<vmem>>, %arg3: memref<1x128xf32, #tpu.memory_space<vmem>>, %arg4: memref<128x128xbf16, #tpu.memory_space<vmem>>, %arg5: memref<1x128xf32, #tpu.memory_space<vmem>>, %arg6: memref<128x128xbf16, #tpu.memory_space<vmem>>, %arg7: memref<1x128xf32, #tpu.memory_space<vmem>>, %arg8: memref<128x128xbf16, #tpu.memory_space<vmem>>, %arg9: memref<1x128xf32, #tpu.memory_space<vmem>>, %arg10: memref<128x128xbf16, #tpu.memory_space<vmem>>, %arg11: memref<1x128xf32, #tpu.memory_space<vmem>>, %arg12: memref<16x128xf32, #tpu.memory_space<vmem>>) attributes {dimension_semantics = [#tpu.dimension_semantics<parallel>], iteration_bounds = array<i64: 1>, scalar_prefetch = 0 : i64, scratch_operands = 0 : i64, tpu.core_type = #tpu.core_type<tc>, window_params = [{transform_indices = @transform_0, window_bounds = array<i64: 16, 1024>}, {pipeline_mode = #tpu.pipeline_mode<synchronous>, transform_indices = @transform_1, window_bounds = array<i64: 1024, 128>}, {pipeline_mode = #tpu.pipeline_mode<synchronous>, transform_indices = @transform_2, window_bounds = array<i64: 1, 128>}, {pipeline_mode = #tpu.pipeline_mode<synchronous>, transform_indices = @transform_3, window_bounds = array<i64: 128, 128>}, {pipeline_mode = #tpu.pipeline_mode<synchronous>, transform_indices = @transform_4, window_bounds = array<i64: 1, 128>}, {pipeline_mode = #tpu.pipeline_mode<synchronous>, transform_indices = @transform_5, window_bounds = array<i64: 128, 128>}, {pipeline_mode = #tpu.pipeline_mode<synchronous>, transform_indices = @transform_6, window_bounds = array<i64: 1, 128>}, {pipeline_mode = #tpu.pipeline_mode<synchronous>, transform_indices = @transform_7, window_bounds = array<i64: 128, 128>}, {pipeline_mode = #tpu.pipeline_mode<synchronous>, transform_indices = @transform_8, window_bounds = array<i64: 1, 128>}, {pipeline_mode = #tpu.pipeline_mode<synchronous>, transform_indices = @transform_9, window_bounds = array<i64: 128, 128>}, {pipeline_mode = #tpu.pipeline_mode<synchronous>, transform_indices = @transform_10, window_bounds = array<i64: 1, 128>}, {transform_indices = @transform_11, window_bounds = array<i64: 16, 128>}]} {
    %c0 = arith.constant 0 : index
    %c0_0 = arith.constant 0 : index
    %0 = vector.load %arg1[%c0, %c0_0] : memref<16x1024xbf16, #tpu.memory_space<vmem>>, vector<16x1024xbf16>
    %c0_1 = arith.constant 0 : index
    %c0_2 = arith.constant 0 : index
    %1 = vector.load %arg2[%c0_1, %c0_2] : memref<1024x128xbf16, #tpu.memory_space<vmem>>, vector<1024x128xbf16>
    %cst = arith.constant dense<0.000000e+00> : vector<16x128xf32>
    %2 = tpu.matmul %0, %1, %cst {dimension_numbers = #tpu.dot_dimension_numbers<[1], [0], [0], [1], [0, 0, 1, 1], [], []>} : vector<16x1024xbf16>, vector<1024x128xbf16>, vector<16x128xf32> -> vector<16x128xf32>
    %c0_3 = arith.constant 0 : index
    %c0_4 = arith.constant 0 : index
    %3 = vector.load %arg3[%c0_3, %c0_4] : memref<1x128xf32, #tpu.memory_space<vmem>>, vector<1x128xf32>
    %4 = vector.broadcast %3 : vector<1x128xf32> to vector<16x128xf32>
    %5 = arith.addf %2, %4 : vector<16x128xf32>
    %cst_5 = arith.constant 0.000000e+00 : f32
    %6 = vector.broadcast %cst_5 : f32 to vector<16x128xf32>
    %7 = arith.maximumf %5, %6 : vector<16x128xf32>
    %8 = arith.truncf %7 : vector<16x128xf32> to vector<16x128xbf16>
    %c0_6 = arith.constant 0 : index
    %c0_7 = arith.constant 0 : index
    %9 = vector.load %arg4[%c0_6, %c0_7] : memref<128x128xbf16, #tpu.memory_space<vmem>>, vector<128x128xbf16>
    %cst_8 = arith.constant dense<0.000000e+00> : vector<16x128xf32>
    %10 = tpu.matmul %8, %9, %cst_8 {dimension_numbers = #tpu.dot_dimension_numbers<[1], [0], [0], [1], [0, 0, 1, 1], [], []>} : vector<16x128xbf16>, vector<128x128xbf16>, vector<16x128xf32> -> vector<16x128xf32>
    %c0_9 = arith.constant 0 : index
    %c0_10 = arith.constant 0 : index
    %11 = vector.load %arg5[%c0_9, %c0_10] : memref<1x128xf32, #tpu.memory_space<vmem>>, vector<1x128xf32>
    %12 = vector.broadcast %11 : vector<1x128xf32> to vector<16x128xf32>
    %13 = arith.addf %10, %12 : vector<16x128xf32>
    %cst_11 = arith.constant 0.000000e+00 : f32
    %14 = vector.broadcast %cst_11 : f32 to vector<16x128xf32>
    %15 = arith.maximumf %13, %14 : vector<16x128xf32>
    %16 = arith.truncf %15 : vector<16x128xf32> to vector<16x128xbf16>
    %c0_12 = arith.constant 0 : index
    %c0_13 = arith.constant 0 : index
    %17 = vector.load %arg6[%c0_12, %c0_13] : memref<128x128xbf16, #tpu.memory_space<vmem>>, vector<128x128xbf16>
    %cst_14 = arith.constant dense<0.000000e+00> : vector<16x128xf32>
    %18 = tpu.matmul %16, %17, %cst_14 {dimension_numbers = #tpu.dot_dimension_numbers<[1], [0], [0], [1], [0, 0, 1, 1], [], []>} : vector<16x128xbf16>, vector<128x128xbf16>, vector<16x128xf32> -> vector<16x128xf32>
    %c0_15 = arith.constant 0 : index
    %c0_16 = arith.constant 0 : index
    %19 = vector.load %arg7[%c0_15, %c0_16] : memref<1x128xf32, #tpu.memory_space<vmem>>, vector<1x128xf32>
    %20 = vector.broadcast %19 : vector<1x128xf32> to vector<16x128xf32>
    %21 = arith.addf %18, %20 : vector<16x128xf32>
    %cst_17 = arith.constant 0.000000e+00 : f32
    %22 = vector.broadcast %cst_17 : f32 to vector<16x128xf32>
    %23 = arith.maximumf %21, %22 : vector<16x128xf32>
    %24 = arith.truncf %23 : vector<16x128xf32> to vector<16x128xbf16>
    %c0_18 = arith.constant 0 : index
    %c0_19 = arith.constant 0 : index
    %25 = vector.load %arg8[%c0_18, %c0_19] : memref<128x128xbf16, #tpu.memory_space<vmem>>, vector<128x128xbf16>
    %cst_20 = arith.constant dense<0.000000e+00> : vector<16x128xf32>
    %26 = tpu.matmul %24, %25, %cst_20 {dimension_numbers = #tpu.dot_dimension_numbers<[1], [0], [0], [1], [0, 0, 1, 1], [], []>} : vector<16x128xbf16>, vector<128x128xbf16>, vector<16x128xf32> -> vector<16x128xf32>
    %c0_21 = arith.constant 0 : index
    %c0_22 = arith.constant 0 : index
    %27 = vector.load %arg9[%c0_21, %c0_22] : memref<1x128xf32, #tpu.memory_space<vmem>>, vector<1x128xf32>
    %28 = vector.broadcast %27 : vector<1x128xf32> to vector<16x128xf32>
    %29 = arith.addf %26, %28 : vector<16x128xf32>
    %cst_23 = arith.constant 0.000000e+00 : f32
    %30 = vector.broadcast %cst_23 : f32 to vector<16x128xf32>
    %31 = arith.maximumf %29, %30 : vector<16x128xf32>
    %32 = arith.truncf %31 : vector<16x128xf32> to vector<16x128xbf16>
    %c0_24 = arith.constant 0 : index
    %c0_25 = arith.constant 0 : index
    %33 = vector.load %arg10[%c0_24, %c0_25] : memref<128x128xbf16, #tpu.memory_space<vmem>>, vector<128x128xbf16>
    %cst_26 = arith.constant dense<0.000000e+00> : vector<16x128xf32>
    %34 = tpu.matmul %32, %33, %cst_26 {dimension_numbers = #tpu.dot_dimension_numbers<[1], [0], [0], [1], [0, 0, 1, 1], [], []>} : vector<16x128xbf16>, vector<128x128xbf16>, vector<16x128xf32> -> vector<16x128xf32>
    %c0_27 = arith.constant 0 : index
    %c0_28 = arith.constant 0 : index
    %35 = vector.load %arg11[%c0_27, %c0_28] : memref<1x128xf32, #tpu.memory_space<vmem>>, vector<1x128xf32>
    %36 = vector.broadcast %35 : vector<1x128xf32> to vector<16x128xf32>
    %37 = arith.addf %34, %36 : vector<16x128xf32>
    %c0_29 = arith.constant 0 : index
    %c0_30 = arith.constant 0 : index
    %38 = vector.load %arg12[%c0_29, %c0_30] : memref<16x128xf32, #tpu.memory_space<vmem>>, vector<16x128xf32>
    tpu.vector_store %arg12[%c0_29, %c0_30], %37 {strides = array<i32>} : memref<16x128xf32, #tpu.memory_space<vmem>>, vector<16x128xf32>,
    return
  }
  func.func @transform_0(%arg0: i32) -> (i32, i32) {
    %c0_i32 = arith.constant 0 : i32
    %c0_i32_0 = arith.constant 0 : i32
    return %arg0, %c0_i32 : i32, i32
  }
  func.func @transform_1(%arg0: i32) -> (i32, i32) {
    %c0_i32 = arith.constant 0 : i32
    %c0_i32_0 = arith.constant 0 : i32
    %c0_i32_1 = arith.constant 0 : i32
    return %c0_i32, %c0_i32_0 : i32, i32
  }
  func.func @transform_2(%arg0: i32) -> (i32, i32) {
    %c0_i32 = arith.constant 0 : i32
    %c0_i32_0 = arith.constant 0 : i32
    %c0_i32_1 = arith.constant 0 : i32
    return %c0_i32, %c0_i32_0 : i32, i32
  }
  func.func @transform_3(%arg0: i32) -> (i32, i32) {
    %c0_i32 = arith.constant 0 : i32
    %c0_i32_0 = arith.constant 0 : i32
    %c0_i32_1 = arith.constant 0 : i32
    return %c0_i32, %c0_i32_0 : i32, i32
  }
  func.func @transform_4(%arg0: i32) -> (i32, i32) {
    %c0_i32 = arith.constant 0 : i32
    %c0_i32_0 = arith.constant 0 : i32
    %c0_i32_1 = arith.constant 0 : i32
    return %c0_i32, %c0_i32_0 : i32, i32
  }
  func.func @transform_5(%arg0: i32) -> (i32, i32) {
    %c0_i32 = arith.constant 0 : i32
    %c0_i32_0 = arith.constant 0 : i32
    %c0_i32_1 = arith.constant 0 : i32
    return %c0_i32, %c0_i32_0 : i32, i32
  }
  func.func @transform_6(%arg0: i32) -> (i32, i32) {
    %c0_i32 = arith.constant 0 : i32
    %c0_i32_0 = arith.constant 0 : i32
    %c0_i32_1 = arith.constant 0 : i32
    return %c0_i32, %c0_i32_0 : i32, i32
  }
  func.func @transform_7(%arg0: i32) -> (i32, i32) {
    %c0_i32 = arith.constant 0 : i32
    %c0_i32_0 = arith.constant 0 : i32
    %c0_i32_1 = arith.constant 0 : i32
    return %c0_i32, %c0_i32_0 : i32, i32
  }
  func.func @transform_8(%arg0: i32) -> (i32, i32) {
    %c0_i32 = arith.constant 0 : i32
    %c0_i32_0 = arith.constant 0 : i32
    %c0_i32_1 = arith.constant 0 : i32
    return %c0_i32, %c0_i32_0 : i32, i32
  }
  func.func @transform_9(%arg0: i32) -> (i32, i32) {
    %c0_i32 = arith.constant 0 : i32
    %c0_i32_0 = arith.constant 0 : i32
    %c0_i32_1 = arith.constant 0 : i32
    return %c0_i32, %c0_i32_0 : i32, i32
  }
  func.func @transform_10(%arg0: i32) -> (i32, i32) {
    %c0_i32 = arith.constant 0 : i32
    %c0_i32_0 = arith.constant 0 : i32
    %c0_i32_1 = arith.constant 0 : i32
    return %c0_i32, %c0_i32_0 : i32, i32
  }
  func.func @transform_11(%arg0: i32) -> (i32, i32) {
    %c0_i32 = arith.constant 0 : i32
    %c0_i32_0 = arith.constant 0 : i32
    return %arg0, %c0_i32 : i32, i32
  }
}

module attributes {stable_mosaic.version = 11 : i64} {
  func.func @mlp_kernel(%arg0: i32, %arg1: memref<16x1024xbf16, #tpu.memory_space<vmem>>, %arg2: memref<1024x128xbf16, #tpu.memory_space<vmem>>, %arg3: memref<1x128xf32, #tpu.memory_space<vmem>>, %arg4: memref<128x128xbf16, #tpu.memory_space<vmem>>, %arg5: memref<1x128xf32, #tpu.memory_space<vmem>>, %arg6: memref<128x128xbf16, #tpu.memory_space<vmem>>, %arg7: memref<1x128xf32, #tpu.memory_space<vmem>>, %arg8: memref<128x128xbf16, #tpu.memory_space<vmem>>, %arg9: memref<1x128xf32, #tpu.memory_space<vmem>>, %arg10: memref<128x128xbf16, #tpu.memory_space<vmem>>, %arg11: memref<1x128xf32, #tpu.memory_space<vmem>>, %arg12: memref<16x128xf32, #tpu.memory_space<vmem>>) attributes {dimension_semantics = [#tpu.dimension_semantics<parallel>], iteration_bounds = array<i64: 1>, scalar_prefetch = 0 : i64, scratch_operands = 0 : i64, tpu.core_type = #tpu.core_type<tc>, window_params = [{transform_indices = @transform_0, window_bounds = array<i64: 16, 1024>}, {pipeline_mode = #tpu.pipeline_mode<synchronous>, transform_indices = @transform_1, window_bounds = array<i64: 1024, 128>}, {pipeline_mode = #tpu.pipeline_mode<synchronous>, transform_indices = @transform_2, window_bounds = array<i64: 1, 128>}, {pipeline_mode = #tpu.pipeline_mode<synchronous>, transform_indices = @transform_3, window_bounds = array<i64: 128, 128>}, {pipeline_mode = #tpu.pipeline_mode<synchronous>, transform_indices = @transform_4, window_bounds = array<i64: 1, 128>}, {pipeline_mode = #tpu.pipeline_mode<synchronous>, transform_indices = @transform_5, window_bounds = array<i64: 128, 128>}, {pipeline_mode = #tpu.pipeline_mode<synchronous>, transform_indices = @transform_6, window_bounds = array<i64: 1, 128>}, {pipeline_mode = #tpu.pipeline_mode<synchronous>, transform_indices = @transform_7, window_bounds = array<i64: 128, 128>}, {pipeline_mode = #tpu.pipeline_mode<synchronous>, transform_indices = @transform_8, window_bounds = array<i64: 1, 128>}, {pipeline_mode = #tpu.pipeline_mode<synchronous>, transform_indices = @transform_9, window_bounds = array<i64: 128, 128>}, {pipeline_mode = #tpu.pipeline_mode<synchronous>, transform_indices = @transform_10, window_bounds = array<i64: 1, 128>}, {transform_indices = @transform_11, window_bounds = array<i64: 16, 128>}]} {
    %c0 = arith.constant 0 : index
    %c0_0 = arith.constant 0 : index
    %0 = vector.load %arg1[%c0, %c0_0] : memref<16x1024xbf16, #tpu.memory_space<vmem>>, vector<16x1024xbf16>
    %c0_1 = arith.constant 0 : index
    %c0_2 = arith.constant 0 : index
    %1 = vector.load %arg2[%c0_1, %c0_2] : memref<1024x128xbf16, #tpu.memory_space<vmem>>, vector<1024x128xbf16>
    %cst = arith.constant dense<0.000000e+00> : vector<16x128xf32>
    %2 = tpu.matmul %0, %1, %cst {dimension_numbers = #tpu.dot_dimension_numbers<[1], [0], [0], [1], [0, 0, 1, 1], [], []>} : vector<16x1024xbf16>, vector<1024x128xbf16>, vector<16x128xf32> -> vector<16x128xf32>
    %c0_3 = arith.constant 0 : index
    %c0_4 = arith.constant 0 : index
    %3 = vector.load %arg3[%c0_3, %c0_4] : memref<1x128xf32, #tpu.memory_space<vmem>>, vector<1x128xf32>
    %4 = vector.broadcast %3 : vector<1x128xf32> to vector<16x128xf32>
    %5 = arith.addf %2, %4 : vector<16x128xf32>
    %cst_5 = arith.constant 0.000000e+00 : f32
    %6 = vector.broadcast %cst_5 : f32 to vector<16x128xf32>
    %7 = arith.maximumf %5, %6 : vector<16x128xf32>
    %8 = arith.truncf %7 : vector<16x128xf32> to vector<16x128xbf16>
    %c0_6 = arith.constant 0 : index
    %c0_7 = arith.constant 0 : index
    %9 = vector.load %arg4[%c0_6, %c0_7] : memref<128x128xbf16, #tpu.memory_space<vmem>>, vector<128x128xbf16>
    %cst_8 = arith.constant dense<0.000000e+00> : vector<16x128xf32>
    %10 = tpu.matmul %8, %9, %cst_8 {dimension_numbers = #tpu.dot_dimension_numbers<[1], [0], [0], [1], [0, 0, 1, 1], [], []>} : vector<16x128xbf16>, vector<128x128xbf16>, vector<16x128xf32> -> vector<16x128xf32>
    %c0_9 = arith.constant 0 : index
    %c0_10 = arith.constant 0 : index
    %11 = vector.load %arg5[%c0_9, %c0_10] : memref<1x128xf32, #tpu.memory_space<vmem>>, vector<1x128xf32>
    %12 = vector.broadcast %11 : vector<1x128xf32> to vector<16x128xf32>
    %13 = arith.addf %10, %12 : vector<16x128xf32>
    %cst_11 = arith.constant 0.000000e+00 : f32
    %14 = vector.broadcast %cst_11 : f32 to vector<16x128xf32>
    %15 = arith.maximumf %13, %14 : vector<16x128xf32>
    %16 = arith.truncf %15 : vector<16x128xf32> to vector<16x128xbf16>
    %c0_12 = arith.constant 0 : index
    %c0_13 = arith.constant 0 : index
    %17 = vector.load %arg6[%c0_12, %c0_13] : memref<128x128xbf16, #tpu.memory_space<vmem>>, vector<128x128xbf16>
    %cst_14 = arith.constant dense<0.000000e+00> : vector<16x128xf32>
    %18 = tpu.matmul %16, %17, %cst_14 {dimension_numbers = #tpu.dot_dimension_numbers<[1], [0], [0], [1], [0, 0, 1, 1], [], []>} : vector<16x128xbf16>, vector<128x128xbf16>, vector<16x128xf32> -> vector<16x128xf32>
    %c0_15 = arith.constant 0 : index
    %c0_16 = arith.constant 0 : index
    %19 = vector.load %arg7[%c0_15, %c0_16] : memref<1x128xf32, #tpu.memory_space<vmem>>, vector<1x128xf32>
    %20 = vector.broadcast %19 : vector<1x128xf32> to vector<16x128xf32>
    %21 = arith.addf %18, %20 : vector<16x128xf32>
    %cst_17 = arith.constant 0.000000e+00 : f32
    %22 = vector.broadcast %cst_17 : f32 to vector<16x128xf32>
    %23 = arith.maximumf %21, %22 : vector<16x128xf32>
    %24 = arith.truncf %23 : vector<16x128xf32> to vector<16x128xbf16>
    %c0_18 = arith.constant 0 : index
    %c0_19 = arith.constant 0 : index
    %25 = vector.load %arg8[%c0_18, %c0_19] : memref<128x128xbf16, #tpu.memory_space<vmem>>, vector<128x128xbf16>
    %cst_20 = arith.constant dense<0.000000e+00> : vector<16x128xf32>
    %26 = tpu.matmul %24, %25, %cst_20 {dimension_numbers = #tpu.dot_dimension_numbers<[1], [0], [0], [1], [0, 0, 1, 1], [], []>} : vector<16x128xbf16>, vector<128x128xbf16>, vector<16x128xf32> -> vector<16x128xf32>
    %c0_21 = arith.constant 0 : index
    %c0_22 = arith.constant 0 : index
    %27 = vector.load %arg9[%c0_21, %c0_22] : memref<1x128xf32, #tpu.memory_space<vmem>>, vector<1x128xf32>
    %28 = vector.broadcast %27 : vector<1x128xf32> to vector<16x128xf32>
    %29 = arith.addf %26, %28 : vector<16x128xf32>
    %cst_23 = arith.constant 0.000000e+00 : f32
    %30 = vector.broadcast %cst_23 : f32 to vector<16x128xf32>
    %31 = arith.maximumf %29, %30 : vector<16x128xf32>
    %32 = arith.truncf %31 : vector<16x128xf32> to vector<16x128xbf16>
    %c0_24 = arith.constant 0 : index
    %c0_25 = arith.constant 0 : index
    %33 = vector.load %arg10[%c0_24, %c0_25] : memref<128x128xbf16, #tpu.memory_space<vmem>>, vector<128x128xbf16>
    %cst_26 = arith.constant dense<0.000000e+00> : vector<16x128xf32>
    %34 = tpu.matmul %32, %33, %cst_26 {dimension_numbers = #tpu.dot_dimension_numbers<[1], [0], [0], [1], [0, 0, 1, 1], [], []>} : vector<16x128xbf16>, vector<128x128xbf16>, vector<16x128xf32> -> vector<16x128xf32>
    %c0_27 = arith.constant 0 : index
    %c0_28 = arith.constant 0 : index
    %35 = vector.load %arg11[%c0_27, %c0_28] : memref<1x128xf32, #tpu.memory_space<vmem>>, vector<1x128xf32>
    %36 = vector.broadcast %35 : vector<1x128xf32> to vector<16x128xf32>
    %37 = arith.addf %34, %36 : vector<16x128xf32>
    %c0_29 = arith.constant 0 : index
    %c0_30 = arith.constant 0 : index
    %38 = vector.load %arg12[%c0_29, %c0_30] : memref<16x128xf32, #tpu.memory_space<vmem>>, vector<16x128xf32>
    tpu.vector_store %arg12[%c0_29, %c0_30], %37 {strides = array<i32>} : memref<16x128xf32, #tpu.memory_space<vmem>>, vector<16x128xf32>,
    return
  }
  func.func @transform_0(%arg0: i32) -> (i32, i32) {
    %c0_i32 = arith.constant 0 : i32
    %c0_i32_0 = arith.constant 0 : i32
    return %arg0, %c0_i32 : i32, i32
  }
  func.func @transform_1(%arg0: i32) -> (i32, i32) {
    %c0_i32 = arith.constant 0 : i32
    %c0_i32_0 = arith.constant 0 : i32
    %c0_i32_1 = arith.constant 0 : i32
    return %c0_i32, %c0_i32_0 : i32, i32
  }
  func.func @transform_2(%arg0: i32) -> (i32, i32) {
    %c0_i32 = arith.constant 0 : i32
    %c0_i32_0 = arith.constant 0 : i32
    %c0_i32_1 = arith.constant 0 : i32
    return %c0_i32, %c0_i32_0 : i32, i32
  }
  func.func @transform_3(%arg0: i32) -> (i32, i32) {
    %c0_i32 = arith.constant 0 : i32
    %c0_i32_0 = arith.constant 0 : i32
    %c0_i32_1 = arith.constant 0 : i32
    return %c0_i32, %c0_i32_0 : i32, i32
  }
  func.func @transform_4(%arg0: i32) -> (i32, i32) {
    %c0_i32 = arith.constant 0 : i32
    %c0_i32_0 = arith.constant 0 : i32
    %c0_i32_1 = arith.constant 0 : i32
    return %c0_i32, %c0_i32_0 : i32, i32
  }
  func.func @transform_5(%arg0: i32) -> (i32, i32) {
    %c0_i32 = arith.constant 0 : i32
    %c0_i32_0 = arith.constant 0 : i32
    %c0_i32_1 = arith.constant 0 : i32
    return %c0_i32, %c0_i32_0 : i32, i32
  }
  func.func @transform_6(%arg0: i32) -> (i32, i32) {
    %c0_i32 = arith.constant 0 : i32
    %c0_i32_0 = arith.constant 0 : i32
    %c0_i32_1 = arith.constant 0 : i32
    return %c0_i32, %c0_i32_0 : i32, i32
  }
  func.func @transform_7(%arg0: i32) -> (i32, i32) {
    %c0_i32 = arith.constant 0 : i32
    %c0_i32_0 = arith.constant 0 : i32
    %c0_i32_1 = arith.constant 0 : i32
    return %c0_i32, %c0_i32_0 : i32, i32
  }
  func.func @transform_8(%arg0: i32) -> (i32, i32) {
    %c0_i32 = arith.constant 0 : i32
    %c0_i32_0 = arith.constant 0 : i32
    %c0_i32_1 = arith.constant 0 : i32
    return %c0_i32, %c0_i32_0 : i32, i32
  }
  func.func @transform_9(%arg0: i32) -> (i32, i32) {
    %c0_i32 = arith.constant 0 : i32
    %c0_i32_0 = arith.constant 0 : i32
    %c0_i32_1 = arith.constant 0 : i32
    return %c0_i32, %c0_i32_0 : i32, i32
  }
  func.func @transform_10(%arg0: i32) -> (i32, i32) {
    %c0_i32 = arith.constant 0 : i32
    %c0_i32_0 = arith.constant 0 : i32
    %c0_i32_1 = arith.constant 0 : i32
    return %c0_i32, %c0_i32_0 : i32, i32
  }
  func.func @transform_11(%arg0: i32) -> (i32, i32) {
    %c0_i32 = arith.constant 0 : i32
    %c0_i32_0 = arith.constant 0 : i32
    return %arg0, %c0_i32 : i32, i32
  }
}

</mosaic_0001>

<bundles_post_ra>
// kernel: tpu_custom_call.1
= control target key start
LH: loop header
LB: loop body
LE: loop exit
PB: predicated region body
PF: predicated region fallthrough
CT: control target
= control target key end

     0   :  { %16 = vsyncpa [#allocation3], 0  ;;  %s2152_s0 = inlined_call_operand.hbm [shape: bf16[16,1024], index: 0, kind: input, shape index: {}]   ;;  %s2153_s1 = inlined_call_operand.hbm [shape: bf16[1024,128], index: 1, kind: input, shape index: {}]   ;;  %s2154_s2 = inlined_call_operand.vmem [shape: f32[1,128], index: 2, kind: input, shape index: {}]   ;;  %s2155_s3 = inlined_call_operand.hbm [shape: bf16[128,128], index: 3, kind: input, shape index: {}]   ;;  %s2156_s4 = inlined_call_operand.vmem [shape: f32[1,128], index: 4, kind: input, shape index: {}]   ;;  %s2157_s5 = inlined_call_operand.hbm [shape: bf16[128,128], index: 5, kind: input, shape index: {}]   ;;  %s2158_s6 = inlined_call_operand.vmem [shape: f32[1,128], index: 6, kind: input, shape index: {}]   ;;  %s2159_s7 = inlined_call_operand.hbm [shape: bf16[128,128], index: 7, kind: input, shape index: {}]   ;;  %s2160_s8 = inlined_call_operand.vmem [shape: f32[1,128], index: 8, kind: input, shape index: {}]   ;;  %s2161_s9 = inlined_call_operand.hbm [shape: bf16[128,128], index: 9, kind: input, shape index: {}]   ;;  %s2162_s10 = inlined_call_operand.vmem [shape: f32[1,128], index: 10, kind: input, shape index: {}]   ;;  %s2163_s11 = inlined_call_operand.hbm [shape: f32[16,128], index: 11, kind: output, shape index: {}]  }
   0x1   :  { %17 = vsyncpa [#allocation6], 0 }
   0x2   :  { %18 = vsyncpa [#allocation9], 0 }
   0x3   :  { %19 = vsyncpa [#allocation12], 0 }
   0x4   :  { %20 = vsyncpa [#allocation4], 0  ;;  %s1923_s17 = smov [#allocation5]   ;;  %s1759_s21 = scalar_lea.hbm %s2153_s1, 8192 }
   0x5   :  { %s38_s18 = sshll.u32 %s1923_s17, 4  ;;  %p1760_p0 = scmp.ne.s32.totalorder %s2153_s1, %s1759_s21  ;;  %s39_s18 = int_to_ptr.vmem [resolvable:$true] %s38_s18 }
   0x6   :  { %p1763_p1 = scmp.lt.u32.totalorder %s1759_s21, %s2153_s1 }
   0x8   :  { %p1765_p2 = pnand %p1763_p1, %p1760_p0 }
   0xa   :  { %1768 = shalt.err (!%p1765_p2)
}
   0xb   :  { %s1769_s26 = scalar_lea.vmem %s39_s18, 8192  ;;  %p1774_p4 = scmp.lt.s32.totalorder %s39_s18, %s39_s18 }
   0xc   :  { %p1770_p3 = scmp.ne.s32.totalorder %s39_s18, %s1769_s26  ;;  %p1775_p5 = scmp.lt.s32.totalorder %s1769_s26, %s1769_s26 }
   0xe   :  { %p1776_p6 = por %p1775_p5, %p1774_p4 }
  0x10   :  { %p1777_p7 = pnand %p1776_p6, %p1770_p3 }
  0x12   :  { %1780 = shalt.err (!%p1777_p7)
}
  0x13   :  { %s1924_s27 = smov 64   ;;  %s1925_s28 = smov 4  }
  0x14   :  { %44 = dma.hbm_to_vmem [thread:$0]  %s2153_s1, 8192, %s39_s18, [#allocation6], %s1924_s27, %s1924_s27, %s1925_s28  }
  0x15   :  { %s1926_s12 = smov [#allocation8]   ;;  %s1927_s14 = smov [#allocation2]  }
  0x16   :  { %s66_s13 = sshll.u32 %s1926_s12, 4  ;;  %s26_s15 = sshll.u32 %s1927_s14, 4  ;;  %s67_s13 = int_to_ptr.vmem [resolvable:$true] %s66_s13  ;;  %s27_s15 = int_to_ptr.vmem [resolvable:$true] %s26_s15 }
  0x17   :  { %s1781_s19 = scalar_lea.hbm %s2157_s5, 1024 }
  0x18   :  { %p1782_p8 = scmp.ne.s32.totalorder %s2157_s5, %s1781_s19  ;;  %p1785_p9 = scmp.lt.u32.totalorder %s1781_s19, %s2157_s5 }
  0x1a   :  { %p1787_p10 = pnand %p1785_p9, %p1782_p8 }
  0x1c   :  { %1790 = shalt.err (!%p1787_p10)
}
  0x1d   :  { %s1791_s1 = scalar_lea.vmem %s67_s13, 1024  ;;  %p1796_p12 = scmp.lt.s32.totalorder %s67_s13, %s67_s13 }
  0x1e   :  { %p1792_p11 = scmp.ne.s32.totalorder %s67_s13, %s1791_s1  ;;  %p1797_p13 = scmp.lt.s32.totalorder %s1791_s1, %s1791_s1 }
  0x20   :  { %p1798_p0 = por %p1797_p13, %p1796_p12 }
  0x22   :  { %p1799_p1 = pnand %p1798_p0, %p1792_p11 }
  0x24   :  { %1802 = shalt.err (!%p1799_p1)
}
  0x25   :  { %72 = dma.hbm_to_vmem [thread:$0]  %s2157_s5, 1024, %s67_s13, [#allocation9], %s1924_s27, %s1924_s27, %s1925_s28  }
  0x26   :  { %s1803_s29 = scalar_lea.hbm %s2152_s0, 1024 }
  0x27   :  { %p1804_p2 = scmp.ne.s32.totalorder %s2152_s0, %s1803_s29  ;;  %p1807_p3 = scmp.lt.u32.totalorder %s1803_s29, %s2152_s0 }
  0x29   :  { %p1809_p4 = pnand %p1807_p3, %p1804_p2 }
  0x2b   :  { %1812 = shalt.err (!%p1809_p4)
}
  0x2c   :  { %s1813_s17 = scalar_lea.vmem %s27_s15, 1024  ;;  %p1818_p6 = scmp.lt.s32.totalorder %s27_s15, %s27_s15 }
  0x2d   :  { %p1814_p5 = scmp.ne.s32.totalorder %s27_s15, %s1813_s17  ;;  %p1819_p7 = scmp.lt.s32.totalorder %s1813_s17, %s1813_s17 }
  0x2f   :  { %p1820_p8 = por %p1819_p7, %p1818_p6 }
  0x31   :  { %p1821_p9 = pnand %p1820_p8, %p1814_p5 }
  0x33   :  { %1824 = shalt.err (!%p1821_p9)
}
  0x34   :  { %s1928_s5 = smov 512   ;;  %s1929_s13 = smov 32  }
  0x35   :  { %32 = dma.hbm_to_vmem [thread:$0]  %s2152_s0, 1024, %s27_s15, [#allocation3], %s1928_s5, %s1928_s5, %s1929_s13  }
  0x36   :  { %s1930_s21 = smov [#allocation7]   ;;  %s1931_s23 = smov [#allocation10]  }
  0x37   :  { %s52_s22 = sshll.u32 %s1930_s21, 4  ;;  %s80_s1 = sshll.u32 %s1931_s23, 4  ;;  %s53_s22 = int_to_ptr.vmem [resolvable:$true] %s52_s22  ;;  %s81_s1 = int_to_ptr.vmem [resolvable:$true] %s80_s1 }
  0x38   :  { %s1825_s25 = scalar_lea.hbm %s2155_s3, 1024 }
  0x39   :  { %p1826_p10 = scmp.ne.s32.totalorder %s2155_s3, %s1825_s25  ;;  %p1829_p11 = scmp.lt.u32.totalorder %s1825_s25, %s2155_s3 }
  0x3b   :  { %p1831_p12 = pnand %p1829_p11, %p1826_p10 }
  0x3d   :  { %1834 = shalt.err (!%p1831_p12)
}
  0x3e   :  { %s1835_s0 = scalar_lea.vmem %s53_s22, 1024  ;;  %p1840_p0 = scmp.lt.s32.totalorder %s53_s22, %s53_s22 }
  0x3f   :  { %p1836_p13 = scmp.ne.s32.totalorder %s53_s22, %s1835_s0  ;;  %p1841_p1 = scmp.lt.s32.totalorder %s1835_s0, %s1835_s0 }
  0x41   :  { %p1842_p2 = por %p1841_p1, %p1840_p0 }
  0x43   :  { %p1843_p3 = pnand %p1842_p2, %p1836_p13 }
  0x45   :  { %1846 = shalt.err (!%p1843_p3)
}
  0x46   :  { %58 = dma.hbm_to_vmem [thread:$0]  %s2155_s3, 1024, %s53_s22, [#allocation6], %s1924_s27, %s1924_s27, %s1925_s28  }
  0x47   :  { %s1847_s5 = scalar_lea.hbm %s2159_s7, 1024 }
  0x48   :  { %p1848_p4 = scmp.ne.s32.totalorder %s2159_s7, %s1847_s5  ;;  %p1851_p5 = scmp.lt.u32.totalorder %s1847_s5, %s2159_s7 }
  0x4a   :  { %p1853_p6 = pnand %p1851_p5, %p1848_p4 }
  0x4c   :  { %1856 = shalt.err (!%p1853_p6)
}
  0x4d   :  { %s1857_s23 = scalar_lea.vmem %s81_s1, 1024  ;;  %p1862_p8 = scmp.lt.s32.totalorder %s81_s1, %s81_s1 }
  0x4e   :  { %p1858_p7 = scmp.ne.s32.totalorder %s81_s1, %s1857_s23  ;;  %p1863_p9 = scmp.lt.s32.totalorder %s1857_s23, %s1857_s23 }
  0x50   :  { %p1864_p10 = por %p1863_p9, %p1862_p8 }
  0x52   :  { %p1865_p11 = pnand %p1864_p10, %p1858_p7 }
  0x54   :  { %1868 = shalt.err (!%p1865_p11)
}
  0x55   :  { %86 = dma.hbm_to_vmem [thread:$0]  %s2159_s7, 1024, %s81_s1, [#allocation9], %s1924_s27, %s1924_s27, %s1925_s28  }
  0x56   :  { %s1932_s18 = smov [#allocation11]   ;;  %s1869_s29 = scalar_lea.hbm %s2161_s9, 1024 }
  0x57   :  { %s94_s24 = sshll.u32 %s1932_s18, 4  ;;  %p1870_p12 = scmp.ne.s32.totalorder %s2161_s9, %s1869_s29  ;;  %s95_s24 = int_to_ptr.vmem [resolvable:$true] %s94_s24 }
  0x58   :  { %p1873_p13 = scmp.lt.u32.totalorder %s1869_s29, %s2161_s9 }
  0x5a   :  { %p1875_p0 = pnand %p1873_p13, %p1870_p12 }
  0x5c   :  { %1878 = shalt.err (!%p1875_p0)
}
  0x5d   :  { %s1879_s14 = scalar_lea.vmem %s95_s24, 1024  ;;  %p1884_p2 = scmp.lt.s32.totalorder %s95_s24, %s95_s24 }
  0x5e   :  { %p1880_p1 = scmp.ne.s32.totalorder %s95_s24, %s1879_s14  ;;  %p1885_p3 = scmp.lt.s32.totalorder %s1879_s14, %s1879_s14 }
  0x60   :  { %p1886_p4 = por %p1885_p3, %p1884_p2 }
  0x62   :  { %p1887_p5 = pnand %p1886_p4, %p1880_p1 }
  0x64   :  { %1890 = shalt.err (!%p1887_p5)
}
  0x65   :  { %100 = dma.hbm_to_vmem [thread:$0]  %s2161_s9, 1024, %s95_s24, [#allocation12], %s1924_s27, %s1924_s27, %s1925_s28  }
  0x66   :  { %1913 = dma.done.wait [#allocation3], 1024  }
  0x67   :  { %1914 = vsyncadd [#allocation3], 4294966272 }
  0x68   :  { %1915 = dma.done.wait [#allocation6], 9216  }
  0x69   :  { %1916 = vsyncadd [#allocation6], 4294958080 }
  0x6a   :  { %1917 = dma.done.wait [#allocation9], 2048  }
  0x6b   :  { %1918 = vsyncadd [#allocation9], 4294965248 }
  0x6c   :  { %1919 = dma.done.wait [#allocation12], 1024  }
  0x6d   :  { %1920 = vsyncadd [#allocation12], 4294966272  ;;  %v1663_v0 = vld [vmem:[#allocation5 + $0x40] sm:$0xff]   ;;  %v1667_v4 = vld [vmem:[#allocation5 + $0x48] sm:$0xff]   ;;  %vm1934_vm0 = vmmov 0   ;;  %s1935_s19 = smov [#allocation13]  }
  0x6e   :  { %v1664_v1 = vld [vmem:[#allocation5 + $0xc0] sm:$0xff]   ;;  %1444 = vmatprep.subr.bf16.mxu0 %v1663_v0  ;;  %v1668_v5 = vld [vmem:[#allocation5 + $0xc8] sm:$0xff]   ;;  %v1671_v8 = vld [vmem:[#allocation5 + $0x50] sm:$0xff]   ;;  %s1320_s20 = sshll.u32 %s1935_s19, 4  ;;  %s1321_s20 = int_to_ptr.vmem [resolvable:$true] %s1320_s20 }
  0x6f   :  { %v1665_v2 = vld [vmem:[#allocation5] sm:$0xff]   ;;  %1466 = vmatprep.subr.bf16.mxu1 %v1664_v1  ;;  %v1669_v6 = vld [vmem:[#allocation5 + $0x8] sm:$0xff]   ;;  %v1672_v9 = vld [vmem:[#allocation5 + $0xd0] sm:$0xff]   ;;  %p1896_p7 = scmp.lt.s32.totalorder %s1321_s20, %s1321_s20 }
  0x70   :  { %v1666_v3 = vld [vmem:[#allocation5 + $0x80] sm:$0xff]   ;;  %1445 = vmatpush3.bf16.msra.mxu0 %v1665_v2  ;;  %v1670_v7 = vld [vmem:[#allocation5 + $0x88] sm:$0xff]   ;;  %v1673_v10 = vld [vmem:[#allocation5 + $0x10] sm:$0xff]  }
  0x71   :  { %1467 = vmatpush3.bf16.msra.mxu1 %v1666_v3  ;;  %1446 = vmatprep.subr.bf16.mxu0 %v1667_v4  ;;  %v1674_v11 = vld [vmem:[#allocation5 + $0x90] sm:$0xff]   ;;  %v1675_v12 = vld [vmem:[#allocation5 + $0x58] sm:$0xff]   ;;  %v1679_v16 = vld [vmem:[#allocation5 + $0x60] sm:$0xff]  }
  0x72   :  { %1468 = vmatprep.subr.bf16.mxu1 %v1668_v5  ;;  %v1676_v13 = vld [vmem:[#allocation5 + $0xd8] sm:$0xff]   ;;  %v1680_v17 = vld [vmem:[#allocation5 + $0xe0] sm:$0xff]   ;;  %v1683_v20 = vld [vmem:[#allocation5 + $0x68] sm:$0xff]  }
  0x73   :  { %v1677_v14 = vld [vmem:[#allocation5 + $0x18] sm:$0xff]   ;;  %v1681_v18 = vld [vmem:[#allocation5 + $0x20] sm:$0xff]   ;;  %v1684_v21 = vld [vmem:[#allocation5 + $0xe8] sm:$0xff]  }
  0x74   :  { %1447 = vmatpush3.bf16.msra.mxu0 %v1669_v6  ;;  %v1678_v15 = vld [vmem:[#allocation5 + $0x98] sm:$0xff]   ;;  %v1682_v19 = vld [vmem:[#allocation5 + $0xa0] sm:$0xff]   ;;  %v1685_v22 = vld [vmem:[#allocation5 + $0x28] sm:$0xff]  }
  0x75   :  { %1469 = vmatpush3.bf16.msra.mxu1 %v1670_v7  ;;  %1448 = vmatprep.subr.bf16.mxu0 %v1671_v8  ;;  %v1686_v23 = vld [vmem:[#allocation5 + $0xa8] sm:$0xff]   ;;  %v1687_v24 = vld [vmem:[#allocation5 + $0x70] sm:$0xff]   ;;  %v1691_v28 = vld [vmem:[#allocation5 + $0x78] sm:$0xff]  }
  0x76   :  { %1470 = vmatprep.subr.bf16.mxu1 %v1672_v9  ;;  %v1688_v25 = vld [vmem:[#allocation5 + $0xf0] sm:$0xff]   ;;  %v1692_v29 = vld [vmem:[#allocation5 + $0xf8] sm:$0xff]   ;;  %v122_v32 = vld [vmem:[#allocation2] sm:$0xff] }
  0x77   :  { %v1689_v26 = vld [vmem:[#allocation5 + $0x30] sm:$0xff]   ;;  %v1693_v30 = vld [vmem:[#allocation5 + $0x38] sm:$0xff]   ;;  %v126_v33 = vld [vmem:[#allocation2 + $0x20] sm:$0xff] }
  0x78   :  { %1449 = vmatpush3.bf16.msra.mxu0 %v1673_v10  ;;  %v1690_v27 = vld [vmem:[#allocation5 + $0xb0] sm:$0xff]   ;;  %v1694_v31 = vld [vmem:[#allocation5 + $0xb8] sm:$0xff]   ;;  %v123_v34 = vld [vmem:[#allocation2 + $0x8] sm:$0xff]  ;;  %v1336_v35 = vcombine.low %v122_v32, %v126_v33  ;;  %v1337_v36 = vcombine.high %v122_v32, %v126_v33 }
  0x79   :  { %1471 = vmatpush3.bf16.msra.mxu1 %v1674_v11  ;;  %1450 = vmatprep.subr.bf16.mxu0 %v1675_v12  ;;  %v127_v37 = vld [vmem:[#allocation2 + $0x28] sm:$0xff]  ;;  %v1695_v40 = vld [vmem:[#allocation5 + $0x140] sm:$0xff]   ;;  %v1703_v48 = vld [vmem:[#allocation5 + $0x150] sm:$0xff]  }
  0x7a   :  { %1472 = vmatprep.subr.bf16.mxu1 %v1676_v13  ;;  %v1338_v38 = vcombine.low %v123_v34, %v127_v37  ;;  %v1339_v39 = vcombine.high %v123_v34, %v127_v37  ;;  %721 = vmatprep.mubr.bf16.mxu0 %v1337_v36  ;;  %v1696_v41 = vld [vmem:[#allocation5 + $0x1c0] sm:$0xff]   ;;  %v1699_v44 = vld [vmem:[#allocation5 + $0x148] sm:$0xff]   ;;  %v1704_v49 = vld [vmem:[#allocation5 + $0x1d0] sm:$0xff]  }
  0x7b   :  { %v1697_v42 = vld [vmem:[#allocation5 + $0x100] sm:$0xff]   ;;  %v1700_v45 = vld [vmem:[#allocation5 + $0x1c8] sm:$0xff]   ;;  %v1705_v50 = vld [vmem:[#allocation5 + $0x110] sm:$0xff]  }
  0x7c   :  { %1451 = vmatpush3.bf16.msra.mxu0 %v1677_v14  ;;  %762 = vmatprep.mubr.bf16.mxu1 %v1339_v39  ;;  %v1698_v43 = vld [vmem:[#allocation5 + $0x180] sm:$0xff]   ;;  %v1701_v46 = vld [vmem:[#allocation5 + $0x108] sm:$0xff]   ;;  %v1706_v51 = vld [vmem:[#allocation5 + $0x190] sm:$0xff]  }
  0x7d   :  { %1473 = vmatpush3.bf16.msra.mxu1 %v1678_v15  ;;  %1452 = vmatprep.subr.bf16.mxu0 %v1679_v16  ;;  %v1702_v47 = vld [vmem:[#allocation5 + $0x188] sm:$0xff]   ;;  %v1707_v52 = vld [vmem:[#allocation5 + $0x158] sm:$0xff]   ;;  %v1711_v56 = vld [vmem:[#allocation5 + $0x160] sm:$0xff]  }
  0x7e   :  { %1474 = vmatprep.subr.bf16.mxu1 %v1680_v17  ;;  %v1708_v53 = vld [vmem:[#allocation5 + $0x1d8] sm:$0xff]   ;;  %v1712_v57 = vld [vmem:[#allocation5 + $0x1e0] sm:$0xff]   ;;  %v1715_v60 = vld [vmem:[#allocation5 + $0x168] sm:$0xff]   ;;  %v1933_v17 = vmov 0.0  }
  0x7f   :  { %v1709_v54 = vld [vmem:[#allocation5 + $0x118] sm:$0xff]   ;;  %v1713_v58 = vld [vmem:[#allocation5 + $0x120] sm:$0xff]   ;;  %v1716_v61 = vld [vmem:[#allocation5 + $0x1e8] sm:$0xff]  }
  0x80   :  { %1453 = vmatpush3.bf16.msra.mxu0 %v1681_v18  ;;  %v1710_v55 = vld [vmem:[#allocation5 + $0x198] sm:$0xff]   ;;  %v1714_v59 = vld [vmem:[#allocation5 + $0x1a0] sm:$0xff]   ;;  %v1717_v62 = vld [vmem:[#allocation5 + $0x128] sm:$0xff]  }
  0x81   :  { %1475 = vmatpush3.bf16.msra.mxu1 %v1682_v19  ;;  %1454 = vmatprep.subr.bf16.mxu0 %v1683_v20  ;;  %v1718_v63 = vld [vmem:[#allocation5 + $0x1a8] sm:$0xff]   ;;  %v1719_v0 = vld [vmem:[#allocation5 + $0x170] sm:$0xff]   ;;  %v1723_v4 = vld [vmem:[#allocation5 + $0x178] sm:$0xff]  }
  0x82   :  { %1476 = vmatprep.subr.bf16.mxu1 %v1684_v21  ;;  %v1720_v1 = vld [vmem:[#allocation5 + $0x1f0] sm:$0xff]   ;;  %v1724_v5 = vld [vmem:[#allocation5 + $0x1f8] sm:$0xff]   ;;  %v1727_v16 = vld [vmem:[#allocation7] sm:$0xff]  }
  0x83   :  { %v1721_v2 = vld [vmem:[#allocation5 + $0x130] sm:$0xff]   ;;  %v1725_v6 = vld [vmem:[#allocation5 + $0x138] sm:$0xff]   ;;  %v1728_v18 = vld [vmem:[#allocation7 + $0x8] sm:$0xff]  }
  0x84   :  { %1455 = vmatpush3.bf16.msra.mxu0 %v1685_v22  ;;  %v1722_v3 = vld [vmem:[#allocation5 + $0x1b0] sm:$0xff]   ;;  %v1726_v7 = vld [vmem:[#allocation5 + $0x1b8] sm:$0xff]   ;;  %v1731_v21 = vld [vmem:[#allocation7 + $0x20] sm:$0xff]  }
  0x85   :  { %1477 = vmatpush3.bf16.msra.mxu1 %v1686_v23  ;;  %1456 = vmatprep.subr.bf16.mxu0 %v1687_v24  ;;  %v124_v8 = vld [vmem:[#allocation2 + $0x10] sm:$0xff]  ;;  %v125_v12 = vld [vmem:[#allocation2 + $0x18] sm:$0xff]  ;;  %v1732_v22 = vld [vmem:[#allocation7 + $0x28] sm:$0xff]  }
  0x86   :  { %1478 = vmatprep.subr.bf16.mxu1 %v1688_v25  ;;  %v128_v9 = vld [vmem:[#allocation2 + $0x30] sm:$0xff]  ;;  %v129_v13 = vld [vmem:[#allocation2 + $0x38] sm:$0xff]  ;;  %v1735_v25 = vld [vmem:[#allocation8] sm:$0xff]  }
  0x87   :  { %v1340_v10 = vcombine.low %v124_v8, %v128_v9  ;;  %v1341_v11 = vcombine.high %v124_v8, %v128_v9  ;;  %v1342_v14 = vcombine.low %v125_v12, %v129_v13  ;;  %v1343_v15 = vcombine.high %v125_v12, %v129_v13  ;;  %v1729_v19 = vld [vmem:[#allocation7 + $0x10] sm:$0xff]   ;;  %v1730_v20 = vld [vmem:[#allocation7 + $0x18] sm:$0xff]   ;;  %v1335_v33 = vld [vmem:[%s2154_s2] ss:$0 sm:$0xff] }
  0x88   :  { %1457 = vmatpush3.bf16.msra.mxu0 %v1689_v26  ;;  %v1733_v23 = vld [vmem:[#allocation7 + $0x30] sm:$0xff]   ;;  %v1734_v24 = vld [vmem:[#allocation7 + $0x38] sm:$0xff]   ;;  %v1736_v26 = vld [vmem:[#allocation8 + $0x8] sm:$0xff]  }
  0x89   :  { %1479 = vmatpush3.bf16.msra.mxu1 %v1690_v27  ;;  %1458 = vmatprep.subr.bf16.mxu0 %v1691_v28  ;;  %v1737_v27 = vld [vmem:[#allocation8 + $0x10] sm:$0xff]   ;;  %v1738_v28 = vld [vmem:[#allocation8 + $0x18] sm:$0xff]   ;;  %v1747_v9 = vld [vmem:[#allocation10 + $0x20] sm:$0xff]  }
  0x8a   :  { %1480 = vmatprep.subr.bf16.mxu1 %v1692_v29  ;;  %v1739_v29 = vld [vmem:[#allocation8 + $0x20] sm:$0xff]   ;;  %v1746_v8 = vld [vmem:[#allocation10 + $0x18] sm:$0xff]  }
  0x8c   :  { %1459 = vmatpush3.bf16.msra.mxu0 %v1693_v30  ;;  %v1740_v30 = vld [vmem:[#allocation8 + $0x28] sm:$0xff]  }
  0x8d   :  { %1481 = vmatpush3.bf16.msra.mxu1 %v1694_v31  ;;  %1488 = vmatprep.subr.bf16.mxu0 %v1695_v40 }
  0x8e   :  { %1510 = vmatprep.subr.bf16.mxu1 %v1696_v41 }
  0x8f   :  { %722 = vmatmul.mubr.bf16.vlgmr.msra.gmra.mrb[0].mxu0 %v1336_v35 }
  0x90   :  { %763 = vmatmul.mubr.bf16.vlgmr.msra.gmra.mrb[0].mxu1 %v1338_v38  ;;  %1489 = vmatpush3.bf16.msra.mxu0 %v1697_v42 }
  0x91   :  { %1511 = vmatpush3.bf16.msra.mxu1 %v1698_v43  ;;  %1490 = vmatprep.subr.bf16.mxu0 %v1699_v44 }
  0x92   :  { %1512 = vmatprep.subr.bf16.mxu1 %v1700_v45  ;;  %803 = vmatprep.mubr.bf16.mxu0 %v1341_v11  ;;  %v1408_v11 = vld [vmem:[%s2156_s4] ss:$0 sm:$0xff] }
  0x93   :  { %844 = vmatprep.mubr.bf16.mxu1 %v1343_v15 }
  0x94   :  { %1491 = vmatpush3.bf16.msra.mxu0 %v1701_v46 }
  0x95   :  { %1513 = vmatpush3.bf16.msra.mxu1 %v1702_v47  ;;  %1492 = vmatprep.subr.bf16.mxu0 %v1703_v48 }
  0x96   :  { %1514 = vmatprep.subr.bf16.mxu1 %v1704_v49 }
  0x98   :  { %1493 = vmatpush3.bf16.msra.mxu0 %v1705_v50 }
  0x99   :  { %1515 = vmatpush3.bf16.msra.mxu1 %v1706_v51  ;;  %1494 = vmatprep.subr.bf16.mxu0 %v1707_v52 }
  0x9a   :  { %1516 = vmatprep.subr.bf16.mxu1 %v1708_v53 }
  0x9c   :  { %1495 = vmatpush3.bf16.msra.mxu0 %v1709_v54 }
  0x9d   :  { %1517 = vmatpush3.bf16.msra.mxu1 %v1710_v55  ;;  %1496 = vmatprep.subr.bf16.mxu0 %v1711_v56 }
  0x9e   :  { %1518 = vmatprep.subr.bf16.mxu1 %v1712_v57 }
  0xa0   :  { %1497 = vmatpush3.bf16.msra.mxu0 %v1713_v58 }
  0xa1   :  { %1519 = vmatpush3.bf16.msra.mxu1 %v1714_v59  ;;  %1498 = vmatprep.subr.bf16.mxu0 %v1715_v60 }
  0xa2   :  { %1520 = vmatprep.subr.bf16.mxu1 %v1716_v61 }
  0xa4   :  { %1499 = vmatpush3.bf16.msra.mxu0 %v1717_v62 }
  0xa5   :  { %1521 = vmatpush3.bf16.msra.mxu1 %v1718_v63  ;;  %1500 = vmatprep.subr.bf16.mxu0 %v1719_v0 }
  0xa6   :  { %1522 = vmatprep.subr.bf16.mxu1 %v1720_v1 }
  0xa8   :  { %1501 = vmatpush3.bf16.msra.mxu0 %v1721_v2 }
  0xa9   :  { %1523 = vmatpush3.bf16.msra.mxu1 %v1722_v3  ;;  %1502 = vmatprep.subr.bf16.mxu0 %v1723_v4  ;;  %v1741_v3 = vld [vmem:[#allocation8 + $0x30] sm:$0xff]   ;;  %v1742_v4 = vld [vmem:[#allocation8 + $0x38] sm:$0xff]  }
  0xaa   :  { %1524 = vmatprep.subr.bf16.mxu1 %v1724_v5  ;;  %v1743_v5 = vld [vmem:[#allocation10] sm:$0xff]  }
  0xac   :  { %1503 = vmatpush3.bf16.msra.mxu0 %v1725_v6  ;;  %v1744_v6 = vld [vmem:[#allocation10 + $0x8] sm:$0xff]  }
  0xad   :  { %1525 = vmatpush3.bf16.msra.mxu1 %v1726_v7  ;;  %1568 = vmatprep.subr.bf16.mxu0 %v1933_v17  ;;  %v1745_v7 = vld [vmem:[#allocation10 + $0x10] sm:$0xff]  }
  0xae   :  { %1588 = vmatprep.subr.bf16.mxu1 %v1933_v17 }
  0xaf   :  { %804 = vmatmul.mubr.bf16.vlgmr.msra.gmra.mrb[4].mxu0 %v1340_v10  ;;  %v1748_v10 = vld [vmem:[#allocation10 + $0x28] sm:$0xff]  }
  0xb0   :  { %845 = vmatmul.mubr.bf16.vlgmr.msra.gmra.mrb[4].mxu1 %v1342_v14  ;;  %1569 = vmatpush3.bf16.msra.mxu0 %v1727_v16 }
  0xb1   :  { %1570 = vmatprep.subr.bf16.mxu0 %v1933_v17  ;;  %1584 = vmatprep.mubr.msk.bf16.mxu0 %vm1934_vm0, %v1933_v17 }
  0xb2   :  { %1604 = vmatprep.mubr.msk.bf16.mxu1 %vm1934_vm0, %v1933_v17  ;;  %1589 = vmatpush3.bf16.msra.mxu1 %v1735_v25  ;;  %v1752_v25 = vld [vmem:[#allocation11 + $0x8] sm:$0xff]  }
  0xb3   :  { %1590 = vmatprep.subr.bf16.mxu1 %v1933_v17 }
  0xb4   :  { %1571 = vmatpush3.bf16.msra.mxu0 %v1728_v18 }
  0xb5   :  { %1572 = vmatprep.subr.bf16.mxu0 %v1933_v17 }
  0xb6   :  { %1591 = vmatpush3.bf16.msra.mxu1 %v1736_v26  ;;  %v1753_v26 = vld [vmem:[#allocation11 + $0x10] sm:$0xff]  }
  0xb7   :  { %1592 = vmatprep.subr.bf16.mxu1 %v1933_v17 }
  0xb8   :  { %1573 = vmatpush3.bf16.msra.mxu0 %v1729_v19 }
  0xb9   :  { %1574 = vmatprep.subr.bf16.mxu0 %v1933_v17 }
  0xba   :  { %1593 = vmatpush3.bf16.msra.mxu1 %v1737_v27  ;;  %v1754_v27 = vld [vmem:[#allocation11 + $0x18] sm:$0xff]  }
  0xbb   :  { %1594 = vmatprep.subr.bf16.mxu1 %v1933_v17 }
  0xbc   :  { %1575 = vmatpush3.bf16.msra.mxu0 %v1730_v20 }
  0xbd   :  { %1576 = vmatprep.subr.bf16.mxu0 %v1933_v17 }
  0xbe   :  { %1595 = vmatpush3.bf16.msra.mxu1 %v1738_v28  ;;  %v1755_v28 = vld [vmem:[#allocation11 + $0x20] sm:$0xff]  }
  0xbf   :  { %1596 = vmatprep.subr.bf16.mxu1 %v1933_v17 }
  0xc0   :  { %1577 = vmatpush3.bf16.msra.mxu0 %v1731_v21 }
  0xc1   :  { %1578 = vmatprep.subr.bf16.mxu0 %v1933_v17 }
  0xc2   :  { %1597 = vmatpush3.bf16.msra.mxu1 %v1739_v29  ;;  %v1756_v29 = vld [vmem:[#allocation11 + $0x28] sm:$0xff]  }
  0xc3   :  { %1598 = vmatprep.subr.bf16.mxu1 %v1933_v17 }
  0xc4   :  { %1579 = vmatpush3.bf16.msra.mxu0 %v1732_v22  ;;  %v1749_v22 = vld [vmem:[#allocation10 + $0x30] sm:$0xff]  }
  0xc5   :  { %1580 = vmatprep.subr.bf16.mxu0 %v1933_v17 }
  0xc6   :  { %1599 = vmatpush3.bf16.msra.mxu1 %v1740_v30  ;;  %v1417_v30 = vld [vmem:[%s2158_s6] ss:$0 sm:$0xff] }
  0xc7   :  { %1600 = vmatprep.subr.bf16.mxu1 %v1933_v17 }
  0xc8   :  { %1581 = vmatpush3.bf16.msra.mxu0 %v1733_v23  ;;  %v1750_v23 = vld [vmem:[#allocation10 + $0x38] sm:$0xff]  }
  0xc9   :  { %1582 = vmatprep.subr.bf16.mxu0 %v1933_v17 }
  0xca   :  { %1601 = vmatpush3.bf16.msra.mxu1 %v1741_v3 }
  0xcb   :  { %1602 = vmatprep.subr.bf16.mxu1 %v1933_v17 }
  0xcc   :  { %1583 = vmatpush3.bf16.msra.mxu0 %v1734_v24  ;;  %v1751_v24 = vld [vmem:[#allocation11] sm:$0xff]  }
  0xcd   :  { %1608 = vmatprep.subr.bf16.mxu0 %v1933_v17 }
  0xce   :  { %1603 = vmatpush3.bf16.msra.mxu1 %v1742_v4 }
  0xcf   :  { %1628 = vmatprep.subr.bf16.mxu1 %v1933_v17 }
 0x162   :  { %v1460_v31 = vpop.f32.mrb[0].mxu0 }
 0x163   :  { %v1482_v32 = vpop.f32.mrb[0].mxu1  ;;  %v1461_v34 = vpop.f32.mrb[1].mxu0 }
 0x164   :  { %v1462_v35 = vadd.f32 %v1461_v34, %v1460_v31  ;;  %v1483_v36 = vpop.f32.mrb[1].mxu1  ;;  %v1463_v37 = vpop.f32.mrb[2].mxu0 }
 0x165   :  { %v1484_v38 = vadd.f32 %v1483_v36, %v1482_v32  ;;  %v1485_v39 = vpop.f32.mrb[2].mxu1  ;;  %v1464_v40 = vpop.f32.mrb[3].mxu0 }
 0x166   :  { %v724_v41 = vadd.f32 %v1462_v35, %v1335_v33  ;;  %v1465_v42 = vadd.f32 %v1464_v40, %v1463_v37  ;;  %v1486_v43 = vpop.f32.mrb[3].mxu1  ;;  %v1757_v40 = vld [vmem:[#allocation11 + $0x30] sm:$0xff]  }
 0x167   :  { %v1487_v44 = vadd.f32 %v1486_v43, %v1485_v39 }
 0x168   :  { %v765_v45 = vadd.f32 %v1484_v38, %v724_v41  ;;  %v727_v46 = vadd.f32 %v1465_v42, %v1335_v33  ;;  %v1758_v41 = vld [vmem:[#allocation11 + $0x38] sm:$0xff]   ;;  %v1426_v42 = vld [vmem:[%s2160_s8] ss:$0 sm:$0xff]  ;;  %s1891_s8 = scalar_lea.vmem %s1321_s20, 256 }
 0x169   :  { %p1892_p6 = scmp.ne.s32.totalorder %s1321_s20, %s1891_s8  ;;  %p1897_p8 = scmp.lt.s32.totalorder %s1891_s8, %s1891_s8 }
 0x16a   :  { %v768_v47 = vadd.f32 %v1487_v44, %v727_v46 }
 0x16b   :  { %p1898_p9 = por %p1897_p8, %p1896_p7 }
 0x16d   :  { %p1899_p10 = pnand %p1898_p9, %p1892_p6 }
 0x182   :  { %v1504_v48 = vpop.f32.mrb[4].mxu0 }
 0x183   :  { %v1526_v49 = vpop.f32.mrb[4].mxu1  ;;  %v1505_v50 = vpop.f32.mrb[5].mxu0 }
 0x184   :  { %v1506_v51 = vadd.f32 %v1505_v50, %v1504_v48  ;;  %v1527_v52 = vpop.f32.mrb[5].mxu1  ;;  %v1507_v53 = vpop.f32.mrb[6].mxu0 }
 0x185   :  { %v1528_v54 = vadd.f32 %v1527_v52, %v1526_v49  ;;  %v1529_v55 = vpop.f32.mrb[6].mxu1  ;;  %v1508_v56 = vpop.f32.mrb[7].mxu0 }
 0x186   :  { %v806_v57 = vadd.f32 %v1506_v51, %v765_v45  ;;  %v1509_v58 = vadd.f32 %v1508_v56, %v1507_v53  ;;  %v1530_v59 = vpop.f32.mrb[7].mxu1 }
 0x187   :  { %v1531_v60 = vadd.f32 %v1530_v59, %v1529_v55 }
 0x188   :  { %v847_v61 = vadd.f32 %v1528_v54, %v806_v57  ;;  %v809_v62 = vadd.f32 %v1509_v58, %v768_v47 }
 0x18a   :  { %v850_v63 = vadd.f32 %v1531_v60, %v809_v62  ;;  %v853_v0 = vmax.f32 %v847_v61, 0.0 }
 0x18c   :  { %v854_v1 = vmax.f32 %v850_v63, 0.0 }
 0x18e   :  { %v855_v2 = vpack.c.bf16 %v854_v1, %v853_v0 }
 0x190   :  { %1585 = vmatmul.mubr.bf16.vlgmr.msra.gmra.mrb[8].mxu0 %v855_v2 }
 0x191   :  { %1624 = vmatprep.mubr.msk.bf16.mxu0 %vm1934_vm0, %v1933_v17  ;;  %1609 = vmatpush3.bf16.msra.mxu0 %v1743_v5 }
 0x192   :  { %1610 = vmatprep.subr.bf16.mxu0 %v1933_v17 }
 0x195   :  { %1611 = vmatpush3.bf16.msra.mxu0 %v1744_v6 }
 0x196   :  { %1612 = vmatprep.subr.bf16.mxu0 %v1933_v17 }
 0x199   :  { %1613 = vmatpush3.bf16.msra.mxu0 %v1745_v7 }
 0x19a   :  { %1614 = vmatprep.subr.bf16.mxu0 %v1933_v17 }
 0x19d   :  { %1615 = vmatpush3.bf16.msra.mxu0 %v1746_v8 }
 0x19e   :  { %1616 = vmatprep.subr.bf16.mxu0 %v1933_v17 }
 0x1a1   :  { %1617 = vmatpush3.bf16.msra.mxu0 %v1747_v9 }
 0x1a2   :  { %1618 = vmatprep.subr.bf16.mxu0 %v1933_v17 }
 0x1a5   :  { %1619 = vmatpush3.bf16.msra.mxu0 %v1748_v10 }
 0x1a6   :  { %1620 = vmatprep.subr.bf16.mxu0 %v1933_v17 }
 0x1a9   :  { %1621 = vmatpush3.bf16.msra.mxu0 %v1749_v22 }
 0x1aa   :  { %1622 = vmatprep.subr.bf16.mxu0 %v1933_v17 }
 0x1ad   :  { %1623 = vmatpush3.bf16.msra.mxu0 %v1750_v23 }
 0x263   :  { %v961_v12 = vpop.f32.mrb[8].mxu0 }
 0x264   :  { %v962_v13 = vadd.f32 %v1408_v11, %v961_v12  ;;  %v1586_v14 = vpop.f32.mrb[9].mxu0 }
 0x265   :  { %v964_v15 = vpop.f32.mrb[10].mxu0 }
 0x266   :  { %v965_v16 = vadd.f32 %v1408_v11, %v964_v15  ;;  %v1587_v18 = vpop.f32.mrb[11].mxu0  ;;  %v968_v19 = vmax.f32 %v962_v13, 0.0 }
 0x268   :  { %v969_v20 = vmax.f32 %v965_v16, 0.0 }
 0x26a   :  { %v970_v21 = vpack.c.bf16 %v969_v20, %v968_v19 }
 0x26c   :  { %1605 = vmatmul.mubr.bf16.vlgmr.msra.gmra.mrb[8].mxu1 %v970_v21 }
 0x26d   :  { %1644 = vmatprep.mubr.msk.bf16.mxu1 %vm1934_vm0, %v1933_v17  ;;  %1629 = vmatpush3.bf16.msra.mxu1 %v1751_v24 }
 0x26e   :  { %1630 = vmatprep.subr.bf16.mxu1 %v1933_v17 }
 0x271   :  { %1631 = vmatpush3.bf16.msra.mxu1 %v1752_v25 }
 0x272   :  { %1632 = vmatprep.subr.bf16.mxu1 %v1933_v17 }
 0x275   :  { %1633 = vmatpush3.bf16.msra.mxu1 %v1753_v26 }
 0x276   :  { %1634 = vmatprep.subr.bf16.mxu1 %v1933_v17 }
 0x279   :  { %1635 = vmatpush3.bf16.msra.mxu1 %v1754_v27 }
 0x27a   :  { %1636 = vmatprep.subr.bf16.mxu1 %v1933_v17 }
 0x27d   :  { %1637 = vmatpush3.bf16.msra.mxu1 %v1755_v28 }
 0x27e   :  { %1638 = vmatprep.subr.bf16.mxu1 %v1933_v17 }
 0x281   :  { %1639 = vmatpush3.bf16.msra.mxu1 %v1756_v29 }
 0x282   :  { %1640 = vmatprep.subr.bf16.mxu1 %v1933_v17 }
 0x285   :  { %1641 = vmatpush3.bf16.msra.mxu1 %v1757_v40 }
 0x286   :  { %1642 = vmatprep.subr.bf16.mxu1 %v1933_v17  ;;  %v1435_v17 = vld [vmem:[%s2162_s10] ss:$0 sm:$0xff] }
 0x289   :  { %1643 = vmatpush3.bf16.msra.mxu1 %v1758_v41 }
 0x33f   :  { %v1076_v31 = vpop.f32.mrb[8].mxu1 }
 0x340   :  { %v1077_v32 = vadd.f32 %v1417_v30, %v1076_v31  ;;  %v1606_v33 = vpop.f32.mrb[9].mxu1 }
 0x341   :  { %v1079_v34 = vpop.f32.mrb[10].mxu1 }
 0x342   :  { %v1080_v35 = vadd.f32 %v1417_v30, %v1079_v34  ;;  %v1607_v36 = vpop.f32.mrb[11].mxu1  ;;  %v1083_v37 = vmax.f32 %v1077_v32, 0.0 }
 0x344   :  { %v1084_v38 = vmax.f32 %v1080_v35, 0.0 }
 0x346   :  { %v1085_v39 = vpack.c.bf16 %v1084_v38, %v1083_v37 }
 0x348   :  { %1625 = vmatmul.mubr.bf16.vlgmr.msra.gmra.mrb[12].mxu0 %v1085_v39 }
 0x41b   :  { %v1191_v43 = vpop.f32.mrb[12].mxu0 }
 0x41c   :  { %v1192_v44 = vadd.f32 %v1426_v42, %v1191_v43  ;;  %v1626_v45 = vpop.f32.mrb[13].mxu0 }
 0x41d   :  { %v1194_v46 = vpop.f32.mrb[14].mxu0 }
 0x41e   :  { %v1195_v47 = vadd.f32 %v1426_v42, %v1194_v46  ;;  %v1627_v48 = vpop.f32.mrb[15].mxu0  ;;  %v1198_v49 = vmax.f32 %v1192_v44, 0.0 }
 0x420   :  { %v1199_v50 = vmax.f32 %v1195_v47, 0.0 }
 0x422   :  { %v1200_v51 = vpack.c.bf16 %v1199_v50, %v1198_v49 }
 0x424   :  { %1645 = vmatmul.mubr.bf16.vlgmr.msra.gmra.mrb[12].mxu1 %v1200_v51 }
 0x4f7   :  { %v1306_v52 = vpop.f32.mrb[12].mxu1 }
 0x4f8   :  { %v1307_v53 = vadd.f32 %v1435_v17, %v1306_v52  ;;  %v1646_v54 = vpop.f32.mrb[13].mxu1 }
 0x4f9   :  { %v1309_v55 = vpop.f32.mrb[14].mxu1 }
 0x4fa   :  { %1313 = vst [vmem:[#allocation13] sm:$0xff] %v1307_v53  ;;  %v1310_v56 = vadd.f32 %v1435_v17, %v1309_v55  ;;  %v1647_v57 = vpop.f32.mrb[15].mxu1 }
 0x4fc   :  { %1314 = vst [vmem:[#allocation13 + $0x8] sm:$0xff] %v1310_v56 }
 0x4fd   :  { %1902 = shalt.err (!%p1899_p10)
}
 0x4fe   :  { %s1903_s23 = scalar_lea.hbm %s2163_s11, 256 }
 0x4ff   :  { %p1904_p11 = scmp.ne.s32.totalorder %s2163_s11, %s1903_s23  ;;  %p1907_p12 = scmp.lt.u32.totalorder %s1903_s23, %s2163_s11 }
 0x501   :  { %p1909_p13 = pnand %p1907_p12, %p1904_p11 }
 0x503   :  { %1912 = shalt.err (!%p1909_p13)
}
 0x504   :  { %s1936_s25 = smov 128   ;;  %s1937_s26 = smov 8  }
 0x505   :  { %1326 = dma.vmem_to_hbm [thread:$0]  %s1321_s20, 256, %s2163_s11, [#allocation4], %s1936_s25, %s1936_s25, %s1937_s26  }
 0x506   :  { %1921 = dma.done.wait [#allocation4], 256  }
 0x507   :  { %1922 = vsyncadd [#allocation4], 4294967040 }
 0x508   :  { %1330 = vsyncpa [#allocation3], 1 }
 0x509   :  { %1331 = vsyncpa [#allocation6], 1 }
 0x50a   :  { %1332 = vsyncpa [#allocation9], 1 }
 0x50b   :  { %1333 = vsyncpa [#allocation12], 1 }
 0x50c   :  { %1334 = vsyncpa [#allocation4], 1 }

// kernel: tpu_custom_call.1
= control target key start
LH: loop header
LB: loop body
LE: loop exit
PB: predicated region body
PF: predicated region fallthrough
CT: control target
= control target key end

     0   :  { %16 = vsyncpa [#allocation3], 0  ;;  %s2152_s0 = inlined_call_operand.hbm [shape: bf16[16,1024], index: 0, kind: input, shape index: {}]   ;;  %s2153_s1 = inlined_call_operand.hbm [shape: bf16[1024,128], index: 1, kind: input, shape index: {}]   ;;  %s2154_s2 = inlined_call_operand.vmem [shape: f32[1,128], index: 2, kind: input, shape index: {}]   ;;  %s2155_s3 = inlined_call_operand.hbm [shape: bf16[128,128], index: 3, kind: input, shape index: {}]   ;;  %s2156_s4 = inlined_call_operand.vmem [shape: f32[1,128], index: 4, kind: input, shape index: {}]   ;;  %s2157_s5 = inlined_call_operand.hbm [shape: bf16[128,128], index: 5, kind: input, shape index: {}]   ;;  %s2158_s6 = inlined_call_operand.vmem [shape: f32[1,128], index: 6, kind: input, shape index: {}]   ;;  %s2159_s7 = inlined_call_operand.hbm [shape: bf16[128,128], index: 7, kind: input, shape index: {}]   ;;  %s2160_s8 = inlined_call_operand.vmem [shape: f32[1,128], index: 8, kind: input, shape index: {}]   ;;  %s2161_s9 = inlined_call_operand.hbm [shape: bf16[128,128], index: 9, kind: input, shape index: {}]   ;;  %s2162_s10 = inlined_call_operand.vmem [shape: f32[1,128], index: 10, kind: input, shape index: {}]   ;;  %s2163_s11 = inlined_call_operand.hbm [shape: f32[16,128], index: 11, kind: output, shape index: {}]  }
   0x1   :  { %17 = vsyncpa [#allocation6], 0 }
   0x2   :  { %18 = vsyncpa [#allocation9], 0 }
   0x3   :  { %19 = vsyncpa [#allocation12], 0 }
   0x4   :  { %20 = vsyncpa [#allocation4], 0  ;;  %s1923_s17 = smov [#allocation5]   ;;  %s1759_s21 = scalar_lea.hbm %s2153_s1, 8192 }
   0x5   :  { %s38_s18 = sshll.u32 %s1923_s17, 4  ;;  %p1760_p0 = scmp.ne.s32.totalorder %s2153_s1, %s1759_s21  ;;  %s39_s18 = int_to_ptr.vmem [resolvable:$true] %s38_s18 }
   0x6   :  { %p1763_p1 = scmp.lt.u32.totalorder %s1759_s21, %s2153_s1 }
   0x8   :  { %p1765_p2 = pnand %p1763_p1, %p1760_p0 }
   0xa   :  { %1768 = shalt.err (!%p1765_p2)
}
   0xb   :  { %s1769_s26 = scalar_lea.vmem %s39_s18, 8192  ;;  %p1774_p4 = scmp.lt.s32.totalorder %s39_s18, %s39_s18 }
   0xc   :  { %p1770_p3 = scmp.ne.s32.totalorder %s39_s18, %s1769_s26  ;;  %p1775_p5 = scmp.lt.s32.totalorder %s1769_s26, %s1769_s26 }
   0xe   :  { %p1776_p6 = por %p1775_p5, %p1774_p4 }
  0x10   :  { %p1777_p7 = pnand %p1776_p6, %p1770_p3 }
  0x12   :  { %1780 = shalt.err (!%p1777_p7)
}
  0x13   :  { %s1924_s27 = smov 64   ;;  %s1925_s28 = smov 4  }
  0x14   :  { %44 = dma.hbm_to_vmem [thread:$0]  %s2153_s1, 8192, %s39_s18, [#allocation6], %s1924_s27, %s1924_s27, %s1925_s28  }
  0x15   :  { %s1926_s12 = smov [#allocation8]   ;;  %s1927_s14 = smov [#allocation2]  }
  0x16   :  { %s66_s13 = sshll.u32 %s1926_s12, 4  ;;  %s26_s15 = sshll.u32 %s1927_s14, 4  ;;  %s67_s13 = int_to_ptr.vmem [resolvable:$true] %s66_s13  ;;  %s27_s15 = int_to_ptr.vmem [resolvable:$true] %s26_s15 }
  0x17   :  { %s1781_s19 = scalar_lea.hbm %s2157_s5, 1024 }
  0x18   :  { %p1782_p8 = scmp.ne.s32.totalorder %s2157_s5, %s1781_s19  ;;  %p1785_p9 = scmp.lt.u32.totalorder %s1781_s19, %s2157_s5 }
  0x1a   :  { %p1787_p10 = pnand %p1785_p9, %p1782_p8 }
  0x1c   :  { %1790 = shalt.err (!%p1787_p10)
}
  0x1d   :  { %s1791_s1 = scalar_lea.vmem %s67_s13, 1024  ;;  %p1796_p12 = scmp.lt.s32.totalorder %s67_s13, %s67_s13 }
  0x1e   :  { %p1792_p11 = scmp.ne.s32.totalorder %s67_s13, %s1791_s1  ;;  %p1797_p13 = scmp.lt.s32.totalorder %s1791_s1, %s1791_s1 }
  0x20   :  { %p1798_p0 = por %p1797_p13, %p1796_p12 }
  0x22   :  { %p1799_p1 = pnand %p1798_p0, %p1792_p11 }
  0x24   :  { %1802 = shalt.err (!%p1799_p1)
}
  0x25   :  { %72 = dma.hbm_to_vmem [thread:$0]  %s2157_s5, 1024, %s67_s13, [#allocation9], %s1924_s27, %s1924_s27, %s1925_s28  }
  0x26   :  { %s1803_s29 = scalar_lea.hbm %s2152_s0, 1024 }
  0x27   :  { %p1804_p2 = scmp.ne.s32.totalorder %s2152_s0, %s1803_s29  ;;  %p1807_p3 = scmp.lt.u32.totalorder %s1803_s29, %s2152_s0 }
  0x29   :  { %p1809_p4 = pnand %p1807_p3, %p1804_p2 }
  0x2b   :  { %1812 = shalt.err (!%p1809_p4)
}
  0x2c   :  { %s1813_s17 = scalar_lea.vmem %s27_s15, 1024  ;;  %p1818_p6 = scmp.lt.s32.totalorder %s27_s15, %s27_s15 }
  0x2d   :  { %p1814_p5 = scmp.ne.s32.totalorder %s27_s15, %s1813_s17  ;;  %p1819_p7 = scmp.lt.s32.totalorder %s1813_s17, %s1813_s17 }
  0x2f   :  { %p1820_p8 = por %p1819_p7, %p1818_p6 }
  0x31   :  { %p1821_p9 = pnand %p1820_p8, %p1814_p5 }
  0x33   :  { %1824 = shalt.err (!%p1821_p9)
}
  0x34   :  { %s1928_s5 = smov 512   ;;  %s1929_s13 = smov 32  }
  0x35   :  { %32 = dma.hbm_to_vmem [thread:$0]  %s2152_s0, 1024, %s27_s15, [#allocation3], %s1928_s5, %s1928_s5, %s1929_s13  }
  0x36   :  { %s1930_s21 = smov [#allocation7]   ;;  %s1931_s23 = smov [#allocation10]  }
  0x37   :  { %s52_s22 = sshll.u32 %s1930_s21, 4  ;;  %s80_s1 = sshll.u32 %s1931_s23, 4  ;;  %s53_s22 = int_to_ptr.vmem [resolvable:$true] %s52_s22  ;;  %s81_s1 = int_to_ptr.vmem [resolvable:$true] %s80_s1 }
  0x38   :  { %s1825_s25 = scalar_lea.hbm %s2155_s3, 1024 }
  0x39   :  { %p1826_p10 = scmp.ne.s32.totalorder %s2155_s3, %s1825_s25  ;;  %p1829_p11 = scmp.lt.u32.totalorder %s1825_s25, %s2155_s3 }
  0x3b   :  { %p1831_p12 = pnand %p1829_p11, %p1826_p10 }
  0x3d   :  { %1834 = shalt.err (!%p1831_p12)
}
  0x3e   :  { %s1835_s0 = scalar_lea.vmem %s53_s22, 1024  ;;  %p1840_p0 = scmp.lt.s32.totalorder %s53_s22, %s53_s22 }
  0x3f   :  { %p1836_p13 = scmp.ne.s32.totalorder %s53_s22, %s1835_s0  ;;  %p1841_p1 = scmp.lt.s32.totalorder %s1835_s0, %s1835_s0 }
  0x41   :  { %p1842_p2 = por %p1841_p1, %p1840_p0 }
  0x43   :  { %p1843_p3 = pnand %p1842_p2, %p1836_p13 }
  0x45   :  { %1846 = shalt.err (!%p1843_p3)
}
  0x46   :  { %58 = dma.hbm_to_vmem [thread:$0]  %s2155_s3, 1024, %s53_s22, [#allocation6], %s1924_s27, %s1924_s27, %s1925_s28  }
  0x47   :  { %s1847_s5 = scalar_lea.hbm %s2159_s7, 1024 }
  0x48   :  { %p1848_p4 = scmp.ne.s32.totalorder %s2159_s7, %s1847_s5  ;;  %p1851_p5 = scmp.lt.u32.totalorder %s1847_s5, %s2159_s7 }
  0x4a   :  { %p1853_p6 = pnand %p1851_p5, %p1848_p4 }
  0x4c   :  { %1856 = shalt.err (!%p1853_p6)
}
  0x4d   :  { %s1857_s23 = scalar_lea.vmem %s81_s1, 1024  ;;  %p1862_p8 = scmp.lt.s32.totalorder %s81_s1, %s81_s1 }
  0x4e   :  { %p1858_p7 = scmp.ne.s32.totalorder %s81_s1, %s1857_s23  ;;  %p1863_p9 = scmp.lt.s32.totalorder %s1857_s23, %s1857_s23 }
  0x50   :  { %p1864_p10 = por %p1863_p9, %p1862_p8 }
  0x52   :  { %p1865_p11 = pnand %p1864_p10, %p1858_p7 }
  0x54   :  { %1868 = shalt.err (!%p1865_p11)
}
  0x55   :  { %86 = dma.hbm_to_vmem [thread:$0]  %s2159_s7, 1024, %s81_s1, [#allocation9], %s1924_s27, %s1924_s27, %s1925_s28  }
  0x56   :  { %s1932_s18 = smov [#allocation11]   ;;  %s1869_s29 = scalar_lea.hbm %s2161_s9, 1024 }
  0x57   :  { %s94_s24 = sshll.u32 %s1932_s18, 4  ;;  %p1870_p12 = scmp.ne.s32.totalorder %s2161_s9, %s1869_s29  ;;  %s95_s24 = int_to_ptr.vmem [resolvable:$true] %s94_s24 }
  0x58   :  { %p1873_p13 = scmp.lt.u32.totalorder %s1869_s29, %s2161_s9 }
  0x5a   :  { %p1875_p0 = pnand %p1873_p13, %p1870_p12 }
  0x5c   :  { %1878 = shalt.err (!%p1875_p0)
}
  0x5d   :  { %s1879_s14 = scalar_lea.vmem %s95_s24, 1024  ;;  %p1884_p2 = scmp.lt.s32.totalorder %s95_s24, %s95_s24 }
  0x5e   :  { %p1880_p1 = scmp.ne.s32.totalorder %s95_s24, %s1879_s14  ;;  %p1885_p3 = scmp.lt.s32.totalorder %s1879_s14, %s1879_s14 }
  0x60   :  { %p1886_p4 = por %p1885_p3, %p1884_p2 }
  0x62   :  { %p1887_p5 = pnand %p1886_p4, %p1880_p1 }
  0x64   :  { %1890 = shalt.err (!%p1887_p5)
}
  0x65   :  { %100 = dma.hbm_to_vmem [thread:$0]  %s2161_s9, 1024, %s95_s24, [#allocation12], %s1924_s27, %s1924_s27, %s1925_s28  }
  0x66   :  { %1913 = dma.done.wait [#allocation3], 1024  }
  0x67   :  { %1914 = vsyncadd [#allocation3], 4294966272 }
  0x68   :  { %1915 = dma.done.wait [#allocation6], 9216  }
  0x69   :  { %1916 = vsyncadd [#allocation6], 4294958080 }
  0x6a   :  { %1917 = dma.done.wait [#allocation9], 2048  }
  0x6b   :  { %1918 = vsyncadd [#allocation9], 4294965248 }
  0x6c   :  { %1919 = dma.done.wait [#allocation12], 1024  }
  0x6d   :  { %1920 = vsyncadd [#allocation12], 4294966272  ;;  %v1663_v0 = vld [vmem:[#allocation5 + $0x40] sm:$0xff]   ;;  %v1667_v4 = vld [vmem:[#allocation5 + $0x48] sm:$0xff]   ;;  %vm1934_vm0 = vmmov 0   ;;  %s1935_s19 = smov [#allocation13]  }
  0x6e   :  { %v1664_v1 = vld [vmem:[#allocation5 + $0xc0] sm:$0xff]   ;;  %1444 = vmatprep.subr.bf16.mxu0 %v1663_v0  ;;  %v1668_v5 = vld [vmem:[#allocation5 + $0xc8] sm:$0xff]   ;;  %v1671_v8 = vld [vmem:[#allocation5 + $0x50] sm:$0xff]   ;;  %s1320_s20 = sshll.u32 %s1935_s19, 4  ;;  %s1321_s20 = int_to_ptr.vmem [resolvable:$true] %s1320_s20 }
  0x6f   :  { %v1665_v2 = vld [vmem:[#allocation5] sm:$0xff]   ;;  %1466 = vmatprep.subr.bf16.mxu1 %v1664_v1  ;;  %v1669_v6 = vld [vmem:[#allocation5 + $0x8] sm:$0xff]   ;;  %v1672_v9 = vld [vmem:[#allocation5 + $0xd0] sm:$0xff]   ;;  %p1896_p7 = scmp.lt.s32.totalorder %s1321_s20, %s1321_s20 }
  0x70   :  { %v1666_v3 = vld [vmem:[#allocation5 + $0x80] sm:$0xff]   ;;  %1445 = vmatpush3.bf16.msra.mxu0 %v1665_v2  ;;  %v1670_v7 = vld [vmem:[#allocation5 + $0x88] sm:$0xff]   ;;  %v1673_v10 = vld [vmem:[#allocation5 + $0x10] sm:$0xff]  }
  0x71   :  { %1467 = vmatpush3.bf16.msra.mxu1 %v1666_v3  ;;  %1446 = vmatprep.subr.bf16.mxu0 %v1667_v4  ;;  %v1674_v11 = vld [vmem:[#allocation5 + $0x90] sm:$0xff]   ;;  %v1675_v12 = vld [vmem:[#allocation5 + $0x58] sm:$0xff]   ;;  %v1679_v16 = vld [vmem:[#allocation5 + $0x60] sm:$0xff]  }
  0x72   :  { %1468 = vmatprep.subr.bf16.mxu1 %v1668_v5  ;;  %v1676_v13 = vld [vmem:[#allocation5 + $0xd8] sm:$0xff]   ;;  %v1680_v17 = vld [vmem:[#allocation5 + $0xe0] sm:$0xff]   ;;  %v1683_v20 = vld [vmem:[#allocation5 + $0x68] sm:$0xff]  }
  0x73   :  { %v1677_v14 = vld [vmem:[#allocation5 + $0x18] sm:$0xff]   ;;  %v1681_v18 = vld [vmem:[#allocation5 + $0x20] sm:$0xff]   ;;  %v1684_v21 = vld [vmem:[#allocation5 + $0xe8] sm:$0xff]  }
  0x74   :  { %1447 = vmatpush3.bf16.msra.mxu0 %v1669_v6  ;;  %v1678_v15 = vld [vmem:[#allocation5 + $0x98] sm:$0xff]   ;;  %v1682_v19 = vld [vmem:[#allocation5 + $0xa0] sm:$0xff]   ;;  %v1685_v22 = vld [vmem:[#allocation5 + $0x28] sm:$0xff]  }
  0x75   :  { %1469 = vmatpush3.bf16.msra.mxu1 %v1670_v7  ;;  %1448 = vmatprep.subr.bf16.mxu0 %v1671_v8  ;;  %v1686_v23 = vld [vmem:[#allocation5 + $0xa8] sm:$0xff]   ;;  %v1687_v24 = vld [vmem:[#allocation5 + $0x70] sm:$0xff]   ;;  %v1691_v28 = vld [vmem:[#allocation5 + $0x78] sm:$0xff]  }
  0x76   :  { %1470 = vmatprep.subr.bf16.mxu1 %v1672_v9  ;;  %v1688_v25 = vld [vmem:[#allocation5 + $0xf0] sm:$0xff]   ;;  %v1692_v29 = vld [vmem:[#allocation5 + $0xf8] sm:$0xff]   ;;  %v122_v32 = vld [vmem:[#allocation2] sm:$0xff] }
  0x77   :  { %v1689_v26 = vld [vmem:[#allocation5 + $0x30] sm:$0xff]   ;;  %v1693_v30 = vld [vmem:[#allocation5 + $0x38] sm:$0xff]   ;;  %v126_v33 = vld [vmem:[#allocation2 + $0x20] sm:$0xff] }
  0x78   :  { %1449 = vmatpush3.bf16.msra.mxu0 %v1673_v10  ;;  %v1690_v27 = vld [vmem:[#allocation5 + $0xb0] sm:$0xff]   ;;  %v1694_v31 = vld [vmem:[#allocation5 + $0xb8] sm:$0xff]   ;;  %v123_v34 = vld [vmem:[#allocation2 + $0x8] sm:$0xff]  ;;  %v1336_v35 = vcombine.low %v122_v32, %v126_v33  ;;  %v1337_v36 = vcombine.high %v122_v32, %v126_v33 }
  0x79   :  { %1471 = vmatpush3.bf16.msra.mxu1 %v1674_v11  ;;  %1450 = vmatprep.subr.bf16.mxu0 %v1675_v12  ;;  %v127_v37 = vld [vmem:[#allocation2 + $0x28] sm:$0xff]  ;;  %v1695_v40 = vld [vmem:[#allocation5 + $0x140] sm:$0xff]   ;;  %v1703_v48 = vld [vmem:[#allocation5 + $0x150] sm:$0xff]  }
  0x7a   :  { %1472 = vmatprep.subr.bf16.mxu1 %v1676_v13  ;;  %v1338_v38 = vcombine.low %v123_v34, %v127_v37  ;;  %v1339_v39 = vcombine.high %v123_v34, %v127_v37  ;;  %721 = vmatprep.mubr.bf16.mxu0 %v1337_v36  ;;  %v1696_v41 = vld [vmem:[#allocation5 + $0x1c0] sm:$0xff]   ;;  %v1699_v44 = vld [vmem:[#allocation5 + $0x148] sm:$0xff]   ;;  %v1704_v49 = vld [vmem:[#allocation5 + $0x1d0] sm:$0xff]  }
  0x7b   :  { %v1697_v42 = vld [vmem:[#allocation5 + $0x100] sm:$0xff]   ;;  %v1700_v45 = vld [vmem:[#allocation5 + $0x1c8] sm:$0xff]   ;;  %v1705_v50 = vld [vmem:[#allocation5 + $0x110] sm:$0xff]  }
  0x7c   :  { %1451 = vmatpush3.bf16.msra.mxu0 %v1677_v14  ;;  %762 = vmatprep.mubr.bf16.mxu1 %v1339_v39  ;;  %v1698_v43 = vld [vmem:[#allocation5 + $0x180] sm:$0xff]   ;;  %v1701_v46 = vld [vmem:[#allocation5 + $0x108] sm:$0xff]   ;;  %v1706_v51 = vld [vmem:[#allocation5 + $0x190] sm:$0xff]  }
  0x7d   :  { %1473 = vmatpush3.bf16.msra.mxu1 %v1678_v15  ;;  %1452 = vmatprep.subr.bf16.mxu0 %v1679_v16  ;;  %v1702_v47 = vld [vmem:[#allocation5 + $0x188] sm:$0xff]   ;;  %v1707_v52 = vld [vmem:[#allocation5 + $0x158] sm:$0xff]   ;;  %v1711_v56 = vld [vmem:[#allocation5 + $0x160] sm:$0xff]  }
  0x7e   :  { %1474 = vmatprep.subr.bf16.mxu1 %v1680_v17  ;;  %v1708_v53 = vld [vmem:[#allocation5 + $0x1d8] sm:$0xff]   ;;  %v1712_v57 = vld [vmem:[#allocation5 + $0x1e0] sm:$0xff]   ;;  %v1715_v60 = vld [vmem:[#allocation5 + $0x168] sm:$0xff]   ;;  %v1933_v17 = vmov 0.0  }
  0x7f   :  { %v1709_v54 = vld [vmem:[#allocation5 + $0x118] sm:$0xff]   ;;  %v1713_v58 = vld [vmem:[#allocation5 + $0x120] sm:$0xff]   ;;  %v1716_v61 = vld [vmem:[#allocation5 + $0x1e8] sm:$0xff]  }
  0x80   :  { %1453 = vmatpush3.bf16.msra.mxu0 %v1681_v18  ;;  %v1710_v55 = vld [vmem:[#allocation5 + $0x198] sm:$0xff]   ;;  %v1714_v59 = vld [vmem:[#allocation5 + $0x1a0] sm:$0xff]   ;;  %v1717_v62 = vld [vmem:[#allocation5 + $0x128] sm:$0xff]  }
  0x81   :  { %1475 = vmatpush3.bf16.msra.mxu1 %v1682_v19  ;;  %1454 = vmatprep.subr.bf16.mxu0 %v1683_v20  ;;  %v1718_v63 = vld [vmem:[#allocation5 + $0x1a8] sm:$0xff]   ;;  %v1719_v0 = vld [vmem:[#allocation5 + $0x170] sm:$0xff]   ;;  %v1723_v4 = vld [vmem:[#allocation5 + $0x178] sm:$0xff]  }
  0x82   :  { %1476 = vmatprep.subr.bf16.mxu1 %v1684_v21  ;;  %v1720_v1 = vld [vmem:[#allocation5 + $0x1f0] sm:$0xff]   ;;  %v1724_v5 = vld [vmem:[#allocation5 + $0x1f8] sm:$0xff]   ;;  %v1727_v16 = vld [vmem:[#allocation7] sm:$0xff]  }
  0x83   :  { %v1721_v2 = vld [vmem:[#allocation5 + $0x130] sm:$0xff]   ;;  %v1725_v6 = vld [vmem:[#allocation5 + $0x138] sm:$0xff]   ;;  %v1728_v18 = vld [vmem:[#allocation7 + $0x8] sm:$0xff]  }
  0x84   :  { %1455 = vmatpush3.bf16.msra.mxu0 %v1685_v22  ;;  %v1722_v3 = vld [vmem:[#allocation5 + $0x1b0] sm:$0xff]   ;;  %v1726_v7 = vld [vmem:[#allocation5 + $0x1b8] sm:$0xff]   ;;  %v1731_v21 = vld [vmem:[#allocation7 + $0x20] sm:$0xff]  }
  0x85   :  { %1477 = vmatpush3.bf16.msra.mxu1 %v1686_v23  ;;  %1456 = vmatprep.subr.bf16.mxu0 %v1687_v24  ;;  %v124_v8 = vld [vmem:[#allocation2 + $0x10] sm:$0xff]  ;;  %v125_v12 = vld [vmem:[#allocation2 + $0x18] sm:$0xff]  ;;  %v1732_v22 = vld [vmem:[#allocation7 + $0x28] sm:$0xff]  }
  0x86   :  { %1478 = vmatprep.subr.bf16.mxu1 %v1688_v25  ;;  %v128_v9 = vld [vmem:[#allocation2 + $0x30] sm:$0xff]  ;;  %v129_v13 = vld [vmem:[#allocation2 + $0x38] sm:$0xff]  ;;  %v1735_v25 = vld [vmem:[#allocation8] sm:$0xff]  }
  0x87   :  { %v1340_v10 = vcombine.low %v124_v8, %v128_v9  ;;  %v1341_v11 = vcombine.high %v124_v8, %v128_v9  ;;  %v1342_v14 = vcombine.low %v125_v12, %v129_v13  ;;  %v1343_v15 = vcombine.high %v125_v12, %v129_v13  ;;  %v1729_v19 = vld [vmem:[#allocation7 + $0x10] sm:$0xff]   ;;  %v1730_v20 = vld [vmem:[#allocation7 + $0x18] sm:$0xff]   ;;  %v1335_v33 = vld [vmem:[%s2154_s2] ss:$0 sm:$0xff] }
  0x88   :  { %1457 = vmatpush3.bf16.msra.mxu0 %v1689_v26  ;;  %v1733_v23 = vld [vmem:[#allocation7 + $0x30] sm:$0xff]   ;;  %v1734_v24 = vld [vmem:[#allocation7 + $0x38] sm:$0xff]   ;;  %v1736_v26 = vld [vmem:[#allocation8 + $0x8] sm:$0xff]  }
  0x89   :  { %1479 = vmatpush3.bf16.msra.mxu1 %v1690_v27  ;;  %1458 = vmatprep.subr.bf16.mxu0 %v1691_v28  ;;  %v1737_v27 = vld [vmem:[#allocation8 + $0x10] sm:$0xff]   ;;  %v1738_v28 = vld [vmem:[#allocation8 + $0x18] sm:$0xff]   ;;  %v1747_v9 = vld [vmem:[#allocation10 + $0x20] sm:$0xff]  }
  0x8a   :  { %1480 = vmatprep.subr.bf16.mxu1 %v1692_v29  ;;  %v1739_v29 = vld [vmem:[#allocation8 + $0x20] sm:$0xff]   ;;  %v1746_v8 = vld [vmem:[#allocation10 + $0x18] sm:$0xff]  }
  0x8c   :  { %1459 = vmatpush3.bf16.msra.mxu0 %v1693_v30  ;;  %v1740_v30 = vld [vmem:[#allocation8 + $0x28] sm:$0xff]  }
  0x8d   :  { %1481 = vmatpush3.bf16.msra.mxu1 %v1694_v31  ;;  %1488 = vmatprep.subr.bf16.mxu0 %v1695_v40 }
  0x8e   :  { %1510 = vmatprep.subr.bf16.mxu1 %v1696_v41 }
  0x8f   :  { %722 = vmatmul.mubr.bf16.vlgmr.msra.gmra.mrb[0].mxu0 %v1336_v35 }
  0x90   :  { %763 = vmatmul.mubr.bf16.vlgmr.msra.gmra.mrb[0].mxu1 %v1338_v38  ;;  %1489 = vmatpush3.bf16.msra.mxu0 %v1697_v42 }
  0x91   :  { %1511 = vmatpush3.bf16.msra.mxu1 %v1698_v43  ;;  %1490 = vmatprep.subr.bf16.mxu0 %v1699_v44 }
  0x92   :  { %1512 = vmatprep.subr.bf16.mxu1 %v1700_v45  ;;  %803 = vmatprep.mubr.bf16.mxu0 %v1341_v11  ;;  %v1408_v11 = vld [vmem:[%s2156_s4] ss:$0 sm:$0xff] }
  0x93   :  { %844 = vmatprep.mubr.bf16.mxu1 %v1343_v15 }
  0x94   :  { %1491 = vmatpush3.bf16.msra.mxu0 %v1701_v46 }
  0x95   :  { %1513 = vmatpush3.bf16.msra.mxu1 %v1702_v47  ;;  %1492 = vmatprep.subr.bf16.mxu0 %v1703_v48 }
  0x96   :  { %1514 = vmatprep.subr.bf16.mxu1 %v1704_v49 }
  0x98   :  { %1493 = vmatpush3.bf16.msra.mxu0 %v1705_v50 }
  0x99   :  { %1515 = vmatpush3.bf16.msra.mxu1 %v1706_v51  ;;  %1494 = vmatprep.subr.bf16.mxu0 %v1707_v52 }
  0x9a   :  { %1516 = vmatprep.subr.bf16.mxu1 %v1708_v53 }
  0x9c   :  { %1495 = vmatpush3.bf16.msra.mxu0 %v1709_v54 }
  0x9d   :  { %1517 = vmatpush3.bf16.msra.mxu1 %v1710_v55  ;;  %1496 = vmatprep.subr.bf16.mxu0 %v1711_v56 }
  0x9e   :  { %1518 = vmatprep.subr.bf16.mxu1 %v1712_v57 }
  0xa0   :  { %1497 = vmatpush3.bf16.msra.mxu0 %v1713_v58 }
  0xa1   :  { %1519 = vmatpush3.bf16.msra.mxu1 %v1714_v59  ;;  %1498 = vmatprep.subr.bf16.mxu0 %v1715_v60 }
  0xa2   :  { %1520 = vmatprep.subr.bf16.mxu1 %v1716_v61 }
  0xa4   :  { %1499 = vmatpush3.bf16.msra.mxu0 %v1717_v62 }
  0xa5   :  { %1521 = vmatpush3.bf16.msra.mxu1 %v1718_v63  ;;  %1500 = vmatprep.subr.bf16.mxu0 %v1719_v0 }
  0xa6   :  { %1522 = vmatprep.subr.bf16.mxu1 %v1720_v1 }
  0xa8   :  { %1501 = vmatpush3.bf16.msra.mxu0 %v1721_v2 }
  0xa9   :  { %1523 = vmatpush3.bf16.msra.mxu1 %v1722_v3  ;;  %1502 = vmatprep.subr.bf16.mxu0 %v1723_v4  ;;  %v1741_v3 = vld [vmem:[#allocation8 + $0x30] sm:$0xff]   ;;  %v1742_v4 = vld [vmem:[#allocation8 + $0x38] sm:$0xff]  }
  0xaa   :  { %1524 = vmatprep.subr.bf16.mxu1 %v1724_v5  ;;  %v1743_v5 = vld [vmem:[#allocation10] sm:$0xff]  }
  0xac   :  { %1503 = vmatpush3.bf16.msra.mxu0 %v1725_v6  ;;  %v1744_v6 = vld [vmem:[#allocation10 + $0x8] sm:$0xff]  }
  0xad   :  { %1525 = vmatpush3.bf16.msra.mxu1 %v1726_v7  ;;  %1568 = vmatprep.subr.bf16.mxu0 %v1933_v17  ;;  %v1745_v7 = vld [vmem:[#allocation10 + $0x10] sm:$0xff]  }
  0xae   :  { %1588 = vmatprep.subr.bf16.mxu1 %v1933_v17 }
  0xaf   :  { %804 = vmatmul.mubr.bf16.vlgmr.msra.gmra.mrb[4].mxu0 %v1340_v10  ;;  %v1748_v10 = vld [vmem:[#allocation10 + $0x28] sm:$0xff]  }
  0xb0   :  { %845 = vmatmul.mubr.bf16.vlgmr.msra.gmra.mrb[4].mxu1 %v1342_v14  ;;  %1569 = vmatpush3.bf16.msra.mxu0 %v1727_v16 }
  0xb1   :  { %1570 = vmatprep.subr.bf16.mxu0 %v1933_v17  ;;  %1584 = vmatprep.mubr.msk.bf16.mxu0 %vm1934_vm0, %v1933_v17 }
  0xb2   :  { %1604 = vmatprep.mubr.msk.bf16.mxu1 %vm1934_vm0, %v1933_v17  ;;  %1589 = vmatpush3.bf16.msra.mxu1 %v1735_v25  ;;  %v1752_v25 = vld [vmem:[#allocation11 + $0x8] sm:$0xff]  }
  0xb3   :  { %1590 = vmatprep.subr.bf16.mxu1 %v1933_v17 }
  0xb4   :  { %1571 = vmatpush3.bf16.msra.mxu0 %v1728_v18 }
  0xb5   :  { %1572 = vmatprep.subr.bf16.mxu0 %v1933_v17 }
  0xb6   :  { %1591 = vmatpush3.bf16.msra.mxu1 %v1736_v26  ;;  %v1753_v26 = vld [vmem:[#allocation11 + $0x10] sm:$0xff]  }
  0xb7   :  { %1592 = vmatprep.subr.bf16.mxu1 %v1933_v17 }
  0xb8   :  { %1573 = vmatpush3.bf16.msra.mxu0 %v1729_v19 }
  0xb9   :  { %1574 = vmatprep.subr.bf16.mxu0 %v1933_v17 }
  0xba   :  { %1593 = vmatpush3.bf16.msra.mxu1 %v1737_v27  ;;  %v1754_v27 = vld [vmem:[#allocation11 + $0x18] sm:$0xff]  }
  0xbb   :  { %1594 = vmatprep.subr.bf16.mxu1 %v1933_v17 }
  0xbc   :  { %1575 = vmatpush3.bf16.msra.mxu0 %v1730_v20 }
  0xbd   :  { %1576 = vmatprep.subr.bf16.mxu0 %v1933_v17 }
  0xbe   :  { %1595 = vmatpush3.bf16.msra.mxu1 %v1738_v28  ;;  %v1755_v28 = vld [vmem:[#allocation11 + $0x20] sm:$0xff]  }
  0xbf   :  { %1596 = vmatprep.subr.bf16.mxu1 %v1933_v17 }
  0xc0   :  { %1577 = vmatpush3.bf16.msra.mxu0 %v1731_v21 }
  0xc1   :  { %1578 = vmatprep.subr.bf16.mxu0 %v1933_v17 }
  0xc2   :  { %1597 = vmatpush3.bf16.msra.mxu1 %v1739_v29  ;;  %v1756_v29 = vld [vmem:[#allocation11 + $0x28] sm:$0xff]  }
  0xc3   :  { %1598 = vmatprep.subr.bf16.mxu1 %v1933_v17 }
  0xc4   :  { %1579 = vmatpush3.bf16.msra.mxu0 %v1732_v22  ;;  %v1749_v22 = vld [vmem:[#allocation10 + $0x30] sm:$0xff]  }
  0xc5   :  { %1580 = vmatprep.subr.bf16.mxu0 %v1933_v17 }
  0xc6   :  { %1599 = vmatpush3.bf16.msra.mxu1 %v1740_v30  ;;  %v1417_v30 = vld [vmem:[%s2158_s6] ss:$0 sm:$0xff] }
  0xc7   :  { %1600 = vmatprep.subr.bf16.mxu1 %v1933_v17 }
  0xc8   :  { %1581 = vmatpush3.bf16.msra.mxu0 %v1733_v23  ;;  %v1750_v23 = vld [vmem:[#allocation10 + $0x38] sm:$0xff]  }
  0xc9   :  { %1582 = vmatprep.subr.bf16.mxu0 %v1933_v17 }
  0xca   :  { %1601 = vmatpush3.bf16.msra.mxu1 %v1741_v3 }
  0xcb   :  { %1602 = vmatprep.subr.bf16.mxu1 %v1933_v17 }
  0xcc   :  { %1583 = vmatpush3.bf16.msra.mxu0 %v1734_v24  ;;  %v1751_v24 = vld [vmem:[#allocation11] sm:$0xff]  }
  0xcd   :  { %1608 = vmatprep.subr.bf16.mxu0 %v1933_v17 }
  0xce   :  { %1603 = vmatpush3.bf16.msra.mxu1 %v1742_v4 }
  0xcf   :  { %1628 = vmatprep.subr.bf16.mxu1 %v1933_v17 }
 0x162   :  { %v1460_v31 = vpop.f32.mrb[0].mxu0 }
 0x163   :  { %v1482_v32 = vpop.f32.mrb[0].mxu1  ;;  %v1461_v34 = vpop.f32.mrb[1].mxu0 }
 0x164   :  { %v1462_v35 = vadd.f32 %v1461_v34, %v1460_v31  ;;  %v1483_v36 = vpop.f32.mrb[1].mxu1  ;;  %v1463_v37 = vpop.f32.mrb[2].mxu0 }
 0x165   :  { %v1484_v38 = vadd.f32 %v1483_v36, %v1482_v32  ;;  %v1485_v39 = vpop.f32.mrb[2].mxu1  ;;  %v1464_v40 = vpop.f32.mrb[3].mxu0 }
 0x166   :  { %v724_v41 = vadd.f32 %v1462_v35, %v1335_v33  ;;  %v1465_v42 = vadd.f32 %v1464_v40, %v1463_v37  ;;  %v1486_v43 = vpop.f32.mrb[3].mxu1  ;;  %v1757_v40 = vld [vmem:[#allocation11 + $0x30] sm:$0xff]  }
 0x167   :  { %v1487_v44 = vadd.f32 %v1486_v43, %v1485_v39 }
 0x168   :  { %v765_v45 = vadd.f32 %v1484_v38, %v724_v41  ;;  %v727_v46 = vadd.f32 %v1465_v42, %v1335_v33  ;;  %v1758_v41 = vld [vmem:[#allocation11 + $0x38] sm:$0xff]   ;;  %v1426_v42 = vld [vmem:[%s2160_s8] ss:$0 sm:$0xff]  ;;  %s1891_s8 = scalar_lea.vmem %s1321_s20, 256 }
 0x169   :  { %p1892_p6 = scmp.ne.s32.totalorder %s1321_s20, %s1891_s8  ;;  %p1897_p8 = scmp.lt.s32.totalorder %s1891_s8, %s1891_s8 }
 0x16a   :  { %v768_v47 = vadd.f32 %v1487_v44, %v727_v46 }
 0x16b   :  { %p1898_p9 = por %p1897_p8, %p1896_p7 }
 0x16d   :  { %p1899_p10 = pnand %p1898_p9, %p1892_p6 }
 0x182   :  { %v1504_v48 = vpop.f32.mrb[4].mxu0 }
 0x183   :  { %v1526_v49 = vpop.f32.mrb[4].mxu1  ;;  %v1505_v50 = vpop.f32.mrb[5].mxu0 }
 0x184   :  { %v1506_v51 = vadd.f32 %v1505_v50, %v1504_v48  ;;  %v1527_v52 = vpop.f32.mrb[5].mxu1  ;;  %v1507_v53 = vpop.f32.mrb[6].mxu0 }
 0x185   :  { %v1528_v54 = vadd.f32 %v1527_v52, %v1526_v49  ;;  %v1529_v55 = vpop.f32.mrb[6].mxu1  ;;  %v1508_v56 = vpop.f32.mrb[7].mxu0 }
 0x186   :  { %v806_v57 = vadd.f32 %v1506_v51, %v765_v45  ;;  %v1509_v58 = vadd.f32 %v1508_v56, %v1507_v53  ;;  %v1530_v59 = vpop.f32.mrb[7].mxu1 }
 0x187   :  { %v1531_v60 = vadd.f32 %v1530_v59, %v1529_v55 }
 0x188   :  { %v847_v61 = vadd.f32 %v1528_v54, %v806_v57  ;;  %v809_v62 = vadd.f32 %v1509_v58, %v768_v47 }
 0x18a   :  { %v850_v63 = vadd.f32 %v1531_v60, %v809_v62  ;;  %v853_v0 = vmax.f32 %v847_v61, 0.0 }
 0x18c   :  { %v854_v1 = vmax.f32 %v850_v63, 0.0 }
 0x18e   :  { %v855_v2 = vpack.c.bf16 %v854_v1, %v853_v0 }
 0x190   :  { %1585 = vmatmul.mubr.bf16.vlgmr.msra.gmra.mrb[8].mxu0 %v855_v2 }
 0x191   :  { %1624 = vmatprep.mubr.msk.bf16.mxu0 %vm1934_vm0, %v1933_v17  ;;  %1609 = vmatpush3.bf16.msra.mxu0 %v1743_v5 }
 0x192   :  { %1610 = vmatprep.subr.bf16.mxu0 %v1933_v17 }
 0x195   :  { %1611 = vmatpush3.bf16.msra.mxu0 %v1744_v6 }
 0x196   :  { %1612 = vmatprep.subr.bf16.mxu0 %v1933_v17 }
 0x199   :  { %1613 = vmatpush3.bf16.msra.mxu0 %v1745_v7 }
 0x19a   :  { %1614 = vmatprep.subr.bf16.mxu0 %v1933_v17 }
 0x19d   :  { %1615 = vmatpush3.bf16.msra.mxu0 %v1746_v8 }
 0x19e   :  { %1616 = vmatprep.subr.bf16.mxu0 %v1933_v17 }
 0x1a1   :  { %1617 = vmatpush3.bf16.msra.mxu0 %v1747_v9 }
 0x1a2   :  { %1618 = vmatprep.subr.bf16.mxu0 %v1933_v17 }
 0x1a5   :  { %1619 = vmatpush3.bf16.msra.mxu0 %v1748_v10 }
 0x1a6   :  { %1620 = vmatprep.subr.bf16.mxu0 %v1933_v17 }
 0x1a9   :  { %1621 = vmatpush3.bf16.msra.mxu0 %v1749_v22 }
 0x1aa   :  { %1622 = vmatprep.subr.bf16.mxu0 %v1933_v17 }
 0x1ad   :  { %1623 = vmatpush3.bf16.msra.mxu0 %v1750_v23 }
 0x263   :  { %v961_v12 = vpop.f32.mrb[8].mxu0 }
 0x264   :  { %v962_v13 = vadd.f32 %v1408_v11, %v961_v12  ;;  %v1586_v14 = vpop.f32.mrb[9].mxu0 }
 0x265   :  { %v964_v15 = vpop.f32.mrb[10].mxu0 }
 0x266   :  { %v965_v16 = vadd.f32 %v1408_v11, %v964_v15  ;;  %v1587_v18 = vpop.f32.mrb[11].mxu0  ;;  %v968_v19 = vmax.f32 %v962_v13, 0.0 }
 0x268   :  { %v969_v20 = vmax.f32 %v965_v16, 0.0 }
 0x26a   :  { %v970_v21 = vpack.c.bf16 %v969_v20, %v968_v19 }
 0x26c   :  { %1605 = vmatmul.mubr.bf16.vlgmr.msra.gmra.mrb[8].mxu1 %v970_v21 }
 0x26d   :  { %1644 = vmatprep.mubr.msk.bf16.mxu1 %vm1934_vm0, %v1933_v17  ;;  %1629 = vmatpush3.bf16.msra.mxu1 %v1751_v24 }
 0x26e   :  { %1630 = vmatprep.subr.bf16.mxu1 %v1933_v17 }
 0x271   :  { %1631 = vmatpush3.bf16.msra.mxu1 %v1752_v25 }
 0x272   :  { %1632 = vmatprep.subr.bf16.mxu1 %v1933_v17 }
 0x275   :  { %1633 = vmatpush3.bf16.msra.mxu1 %v1753_v26 }
 0x276   :  { %1634 = vmatprep.subr.bf16.mxu1 %v1933_v17 }
 0x279   :  { %1635 = vmatpush3.bf16.msra.mxu1 %v1754_v27 }
 0x27a   :  { %1636 = vmatprep.subr.bf16.mxu1 %v1933_v17 }
 0x27d   :  { %1637 = vmatpush3.bf16.msra.mxu1 %v1755_v28 }
 0x27e   :  { %1638 = vmatprep.subr.bf16.mxu1 %v1933_v17 }
 0x281   :  { %1639 = vmatpush3.bf16.msra.mxu1 %v1756_v29 }
 0x282   :  { %1640 = vmatprep.subr.bf16.mxu1 %v1933_v17 }
 0x285   :  { %1641 = vmatpush3.bf16.msra.mxu1 %v1757_v40 }
 0x286   :  { %1642 = vmatprep.subr.bf16.mxu1 %v1933_v17  ;;  %v1435_v17 = vld [vmem:[%s2162_s10] ss:$0 sm:$0xff] }
 0x289   :  { %1643 = vmatpush3.bf16.msra.mxu1 %v1758_v41 }
 0x33f   :  { %v1076_v31 = vpop.f32.mrb[8].mxu1 }
 0x340   :  { %v1077_v32 = vadd.f32 %v1417_v30, %v1076_v31  ;;  %v1606_v33 = vpop.f32.mrb[9].mxu1 }
 0x341   :  { %v1079_v34 = vpop.f32.mrb[10].mxu1 }
 0x342   :  { %v1080_v35 = vadd.f32 %v1417_v30, %v1079_v34  ;;  %v1607_v36 = vpop.f32.mrb[11].mxu1  ;;  %v1083_v37 = vmax.f32 %v1077_v32, 0.0 }
 0x344   :  { %v1084_v38 = vmax.f32 %v1080_v35, 0.0 }
 0x346   :  { %v1085_v39 = vpack.c.bf16 %v1084_v38, %v1083_v37 }
 0x348   :  { %1625 = vmatmul.mubr.bf16.vlgmr.msra.gmra.mrb[12].mxu0 %v1085_v39 }
 0x41b   :  { %v1191_v43 = vpop.f32.mrb[12].mxu0 }
 0x41c   :  { %v1192_v44 = vadd.f32 %v1426_v42, %v1191_v43  ;;  %v1626_v45 = vpop.f32.mrb[13].mxu0 }
 0x41d   :  { %v1194_v46 = vpop.f32.mrb[14].mxu0 }
 0x41e   :  { %v1195_v47 = vadd.f32 %v1426_v42, %v1194_v46  ;;  %v1627_v48 = vpop.f32.mrb[15].mxu0  ;;  %v1198_v49 = vmax.f32 %v1192_v44, 0.0 }
 0x420   :  { %v1199_v50 = vmax.f32 %v1195_v47, 0.0 }
 0x422   :  { %v1200_v51 = vpack.c.bf16 %v1199_v50, %v1198_v49 }
 0x424   :  { %1645 = vmatmul.mubr.bf16.vlgmr.msra.gmra.mrb[12].mxu1 %v1200_v51 }
 0x4f7   :  { %v1306_v52 = vpop.f32.mrb[12].mxu1 }
 0x4f8   :  { %v1307_v53 = vadd.f32 %v1435_v17, %v1306_v52  ;;  %v1646_v54 = vpop.f32.mrb[13].mxu1 }
 0x4f9   :  { %v1309_v55 = vpop.f32.mrb[14].mxu1 }
 0x4fa   :  { %1313 = vst [vmem:[#allocation13] sm:$0xff] %v1307_v53  ;;  %v1310_v56 = vadd.f32 %v1435_v17, %v1309_v55  ;;  %v1647_v57 = vpop.f32.mrb[15].mxu1 }
 0x4fc   :  { %1314 = vst [vmem:[#allocation13 + $0x8] sm:$0xff] %v1310_v56 }
 0x4fd   :  { %1902 = shalt.err (!%p1899_p10)
}
 0x4fe   :  { %s1903_s23 = scalar_lea.hbm %s2163_s11, 256 }
 0x4ff   :  { %p1904_p11 = scmp.ne.s32.totalorder %s2163_s11, %s1903_s23  ;;  %p1907_p12 = scmp.lt.u32.totalorder %s1903_s23, %s2163_s11 }
 0x501   :  { %p1909_p13 = pnand %p1907_p12, %p1904_p11 }
 0x503   :  { %1912 = shalt.err (!%p1909_p13)
}
 0x504   :  { %s1936_s25 = smov 128   ;;  %s1937_s26 = smov 8  }
 0x505   :  { %1326 = dma.vmem_to_hbm [thread:$0]  %s1321_s20, 256, %s2163_s11, [#allocation4], %s1936_s25, %s1936_s25, %s1937_s26  }
 0x506   :  { %1921 = dma.done.wait [#allocation4], 256  }
 0x507   :  { %1922 = vsyncadd [#allocation4], 4294967040 }
 0x508   :  { %1330 = vsyncpa [#allocation3], 1 }
 0x509   :  { %1331 = vsyncpa [#allocation6], 1 }
 0x50a   :  { %1332 = vsyncpa [#allocation9], 1 }
 0x50b   :  { %1333 = vsyncpa [#allocation12], 1 }
 0x50c   :  { %1334 = vsyncpa [#allocation4], 1 }

</bundles_post_ra>
